<compile_context>
chip_gen: v5e
topology: v5e:2x2
jax: 0.10.0
libtpu: 0.0.40
codegen_flags: <defaults>
</compile_context>

<pallas_src>
import functools

import jax
import jax.numpy as jnp
from jax import lax
from jax.experimental import pallas as pl
from jax.experimental.pallas import tpu as pltpu


def _round_up(x, m):
  return (x + m - 1) // m * m


def _vmem_capacity_bytes():
  try:
    return int(pltpu.get_tpu_info().vmem_capacity_bytes)
  except Exception:
    return 64 * 1024 * 1024  # v7x per-TC capacity (smallest across gens)


def _pick_tile_h(H, W, Hp, Wp, Cp, Cop, budget_bytes):
  """Largest divisor of H whose per-step VMEM estimate fits the budget."""
  def est(th):
    inp = 2 * Hp * Wp * Cp * 4                 # resident padded input (x2 bufs)
    outb = 2 * th * W * Cop * 4                # output block (x2 bufs)
    tmp = (4 * (th + 2) * W * Cp               # xw + 3 column-shifted views
           + th * W * Cp                       # f32 depthwise accumulator
           + 2 * th * W * Cop) * 4             # matmul result + store temp
    wts = 2 * (9 * Cp + Cp * Cop + Cop) * 4    # dw + pw + shift (x2 bufs)
    return inp + outb + tmp + wts

  for th in range(H, 0, -1):
    if H % th == 0 and est(th) <= budget_bytes:
      return th
  return 1  # TODO(synk): fall back to in-kernel halo DMA for huge activations


def _sepconv_kernel(x_ref, dw_ref, pw_ref, shift_ref, o_ref, *,
                    TILE_H, W, Cp, Cop, activation):
  # x_ref:     (1, H+2, W+2, Cp)  padded input, resident across the H-tile axis
  # dw_ref:    (3, 3, Cp)         depthwise taps (zero-padded channels)
  # pw_ref:    (Cp, Cop)          pointwise weights with BN scale folded in
  # shift_ref: (1, Cop)           folded bias*scale + BN shift
  # o_ref:     (1, TILE_H, W, Cop)
  i = pl.program_id(1)
  row0 = pl.multiple_of(i * TILE_H, TILE_H)

  # Window of rows needed for this output tile (TILE_H + 2-row halo).
  xw = x_ref[0, pl.ds(row0, TILE_H + 2), :, :].astype(jnp.float32)

  # Handle the column (W) halo once: 3 W-shifted views of the whole window.
  # The 9-tap loop below then only slices along H (outer dim, no relayout).
  cols = [xw[:, kw:kw + W, :] for kw in range(3)]     # (TILE_H+2, W, Cp) each

  dw = dw_ref[...].astype(jnp.float32)                # (3, 3, Cp)
  acc = jnp.zeros((TILE_H, W, Cp), jnp.float32)
  for kh in range(3):
    for kw in range(3):
      acc = acc + cols[kw][kh:kh + TILE_H] * dw[kh, kw, :]

  # Pointwise 1x1 conv (BN scale pre-folded into pw) on the MXU.
  y = jnp.dot(acc.reshape(TILE_H * W, Cp).astype(pw_ref.dtype),
              pw_ref[...],
              preferred_element_type=jnp.float32)
  y = y + shift_ref[...].astype(jnp.float32)

  if activation:  # MemoryEfficientSwish forward: x * sigmoid(x)
    y = y * jax.nn.sigmoid(y)

  o_ref[0] = y.reshape(TILE_H, W, Cop).astype(o_ref.dtype)


def separable_conv_block(x_nhwc, dw_w, pw_w, pw_b, bn_gamma, bn_beta,
                         bn_mean, bn_var, *, eps=1e-3, activation=False):
  """x_nhwc: (B, H, W, Cin) float32.  Returns (B, H, W, Cout)."""
  B, H, W, Cin = x_nhwc.shape
  Cout = pw_w.shape[1]
  Cp = _round_up(Cin, 128)
  Cop = _round_up(Cout, 128)
  Hp, Wp = H + 2, W + 2

  # Fold inference BN + pointwise bias into the pointwise weights (in f32):
  #   scale = gamma / sqrt(var + eps)
  #   out   = dw(x) @ (pw * scale) + (b * scale + beta - mean * scale)
  inv_std = 1.0 / jnp.sqrt(bn_var.astype(jnp.float32) + eps)
  scale = bn_gamma.astype(jnp.float32) * inv_std
  pw_fold = pw_w.astype(jnp.float32) * scale[None, :]
  shift_fold = (pw_b.astype(jnp.float32) * scale
                + bn_beta.astype(jnp.float32)
                - bn_mean.astype(jnp.float32) * scale)

  # bf16 MXU inputs for realistic channel counts; f32 for tiny C (tolerance).
  mxu_dtype = jnp.bfloat16 if min(Cin, Cout) >= 128 else jnp.float32

  # Zero-pad channels to lane-dense multiples of 128 and add the 1px "same"
  # spatial halo in a single pad pass.
  # TODO(synk): for very large activations, fetch the halo rows in-kernel
  # (manual DMA) instead of the wrapper-side jnp.pad round-trip.
  xp = jnp.pad(x_nhwc, ((0, 0), (1, 1), (1, 1), (0, Cp - Cin)))
  dw_p = jnp.pad(dw_w, ((0, 0), (0, 0), (0, Cp - Cin)))
  pw_p = jnp.pad(pw_fold, ((0, Cp - Cin), (0, Cop - Cout))).astype(mxu_dtype)
  shift_p = jnp.pad(shift_fold, (0, Cop - Cout)).reshape(1, Cop)

  # Generation-aware tile height + explicit VMEM limit.
  vmem_cap = _vmem_capacity_bytes()
  TILE_H = _pick_tile_h(H, W, Hp, Wp, Cp, Cop, budget_bytes=vmem_cap // 3)
  n_h = H // TILE_H
  vmem_limit = min(int(vmem_cap * 3 // 4), 100 * 1024 * 1024)

  kernel = functools.partial(_sepconv_kernel, TILE_H=TILE_H, W=W, Cp=Cp,
                             Cop=Cop, activation=activation)

  out_p = pl.pallas_call(
      kernel,
      out_shape=jax.ShapeDtypeStruct((B, H, W, Cop), x_nhwc.dtype),
      grid_spec=pltpu.PrefetchScalarGridSpec(
          num_scalar_prefetch=0,
          grid=(B, n_h),
          in_specs=[
              # Full padded image per batch; index constant across the H-tile
              # axis so it is DMA'd once per batch and revisited.
              pl.BlockSpec((1, Hp, Wp, Cp), lambda b, i: (b, 0, 0, 0)),
              pl.BlockSpec((3, 3, Cp), lambda b, i: (0, 0, 0)),
              pl.BlockSpec((Cp, Cop), lambda b, i: (0, 0)),
              pl.BlockSpec((1, Cop), lambda b, i: (0, 0)),
          ],
          out_specs=pl.BlockSpec((1, TILE_H, W, Cop),
                                 lambda b, i: (b, i, 0, 0)),
      ),
      compiler_params=pltpu.CompilerParams(
          dimension_semantics=("parallel", "parallel"),
          vmem_limit_bytes=vmem_limit),
  )(xp, dw_p, pw_p, shift_p)

  # Drop the padded output channels (lane padding only).
  return out_p[..., :Cout]


def _reference(x_nhwc, dw_w, pw_w, pw_b, gamma, beta, mean, var, eps,
               activation):
  """Pure-JAX reference (lax convs) mirroring the PyTorch forward."""
  Cin = x_nhwc.shape[-1]
  dw = dw_w.reshape(3, 3, 1, Cin)  # HWIO with I=1 (feature_group_count=Cin)
  y = lax.conv_general_dilated(
      x_nhwc, dw, window_strides=(1, 1), padding=((1, 1), (1, 1)),
      dimension_numbers=("NHWC", "HWIO", "NHWC"), feature_group_count=Cin)
  y = jnp.einsum("bhwc,co->bhwo", y, pw_w) + pw_b
  y = (y - mean) / jnp.sqrt(var + eps) * gamma + beta
  if activation:
    y = y * jax.nn.sigmoid(y)
  return y


if __name__ == "__main__":
  key = jax.random.PRNGKey(0)
  B, Cin, H, W = 2, 4, 16, 16
  Cout = 8

  ks = jax.random.split(key, 8)
  x_nchw = jax.random.normal(ks[0], (B, Cin, H, W), dtype=jnp.float32)
  dw_w = jax.random.normal(ks[1], (3, 3, Cin), dtype=jnp.float32) * 0.2
  pw_w = jax.random.normal(ks[2], (Cin, Cout), dtype=jnp.float32) * 0.2
  pw_b = jax.random.normal(ks[3], (Cout,), dtype=jnp.float32) * 0.1
  bn_gamma = 1.0 + 0.1 * jax.random.normal(ks[4], (Cout,), dtype=jnp.float32)
  bn_beta = 0.1 * jax.random.normal(ks[5], (Cout,), dtype=jnp.float32)
  bn_mean = 0.1 * jax.random.normal(ks[6], (Cout,), dtype=jnp.float32)
  bn_var = jnp.abs(jax.random.normal(ks[7], (Cout,), dtype=jnp.float32)) + 0.5
  eps = 1e-3  # matches nn.BatchNorm2d(..., eps=0.001) in the module

  # NCHW (PyTorch convention) -> NHWC for the TPU kernel.
  x_nhwc = jnp.transpose(x_nchw, (0, 2, 3, 1))

  for act in (False, True):  # module default activation=False; also test swish
    out = separable_conv_block(x_nhwc, dw_w, pw_w, pw_b, bn_gamma, bn_beta,
                               bn_mean, bn_var, eps=eps, activation=act)
    out = jax.block_until_ready(out)
    ref = _reference(x_nhwc, dw_w, pw_w, pw_b, bn_gamma, bn_beta, bn_mean,
                     bn_var, eps, act)
    assert out.shape == (B, H, W, Cout)
    assert jnp.allclose(out, ref, atol=2e-4, rtol=2e-4), (
        f"mismatch vs reference (activation={act})")

  print("KERNEL_OK")
</pallas_src>

<mosaic_0001>
module attributes {stable_mosaic.version = 11 : i64} {
  func.func @_sepconv_kernel(%arg0: i32, %arg1: i32, %arg2: memref<1x18x18x128xf32, #tpu.memory_space<vmem>>, %arg3: memref<3x3x128xf32, #tpu.memory_space<vmem>>, %arg4: memref<128x128xf32, #tpu.memory_space<vmem>>, %arg5: memref<1x128xf32, #tpu.memory_space<vmem>>, %arg6: memref<1x16x16x128xf32, #tpu.memory_space<vmem>>) attributes {dimension_semantics = [#tpu.dimension_semantics<parallel>, #tpu.dimension_semantics<parallel>], iteration_bounds = array<i64: 2, 1>, scalar_prefetch = 0 : i64, scratch_operands = 0 : i64, tpu.core_type = #tpu.core_type<tc>, window_params = [{transform_indices = @transform_0, window_bounds = array<i64: 1, 18, 18, 128>}, {pipeline_mode = #tpu.pipeline_mode<synchronous>, transform_indices = @transform_1, window_bounds = array<i64: 3, 3, 128>}, {pipeline_mode = #tpu.pipeline_mode<synchronous>, transform_indices = @transform_2, window_bounds = array<i64: 128, 128>}, {pipeline_mode = #tpu.pipeline_mode<synchronous>, transform_indices = @transform_3, window_bounds = array<i64: 1, 128>}, {transform_indices = @transform_4, window_bounds = array<i64: 1, 16, 16, 128>}]} {
    %c16_i32 = arith.constant 16 : i32
    %0 = arith.muli %arg1, %c16_i32 : i32
    %1 = tpu.assume_multiple %0, 16 : i32
    %c0 = arith.constant 0 : index
    %2 = arith.index_cast %1 : i32 to index
    %c0_0 = arith.constant 0 : index
    %c0_1 = arith.constant 0 : index
    %3 = vector.load %arg2[%c0, %2, %c0_0, %c0_1] : memref<1x18x18x128xf32, #tpu.memory_space<vmem>>, vector<1x18x18x128xf32>
    %4 = vector.shape_cast %3 : vector<1x18x18x128xf32> to vector<18x18x128xf32>
    %5 = vector.extract_strided_slice %4 {offsets = [0, 0, 0], sizes = [18, 16, 128], strides = [1, 1, 1]} : vector<18x18x128xf32> to vector<18x16x128xf32>
    %6 = vector.extract_strided_slice %4 {offsets = [0, 1, 0], sizes = [18, 16, 128], strides = [1, 1, 1]} : vector<18x18x128xf32> to vector<18x16x128xf32>
    %7 = vector.extract_strided_slice %4 {offsets = [0, 2, 0], sizes = [18, 16, 128], strides = [1, 1, 1]} : vector<18x18x128xf32> to vector<18x16x128xf32>
    %c0_2 = arith.constant 0 : index
    %c0_3 = arith.constant 0 : index
    %c0_4 = arith.constant 0 : index
    %8 = vector.load %arg3[%c0_2, %c0_3, %c0_4] : memref<3x3x128xf32, #tpu.memory_space<vmem>>, vector<3x3x128xf32>
    %cst = arith.constant 0.000000e+00 : f32
    %9 = vector.broadcast %cst : f32 to vector<16x16x128xf32>
    %10 = vector.extract_strided_slice %5 {offsets = [0, 0, 0], sizes = [16, 16, 128], strides = [1, 1, 1]} : vector<18x16x128xf32> to vector<16x16x128xf32>
    %11 = vector.extract_strided_slice %8 {offsets = [0, 0, 0], sizes = [1, 1, 128], strides = [1, 1, 1]} : vector<3x3x128xf32> to vector<1x1x128xf32>
    %12 = vector.shape_cast %11 : vector<1x1x128xf32> to vector<128xf32>
    %13 = vector.shape_cast %12 : vector<128xf32> to vector<1x1x128xf32>
    %14 = vector.broadcast %13 : vector<1x1x128xf32> to vector<16x16x128xf32>
    %15 = arith.mulf %10, %14 : vector<16x16x128xf32>
    %16 = arith.addf %9, %15 : vector<16x16x128xf32>
    %17 = vector.extract_strided_slice %6 {offsets = [0, 0, 0], sizes = [16, 16, 128], strides = [1, 1, 1]} : vector<18x16x128xf32> to vector<16x16x128xf32>
    %18 = vector.extract_strided_slice %8 {offsets = [0, 1, 0], sizes = [1, 1, 128], strides = [1, 1, 1]} : vector<3x3x128xf32> to vector<1x1x128xf32>
    %19 = vector.shape_cast %18 : vector<1x1x128xf32> to vector<128xf32>
    %20 = vector.shape_cast %19 : vector<128xf32> to vector<1x1x128xf32>
    %21 = vector.broadcast %20 : vector<1x1x128xf32> to vector<16x16x128xf32>
    %22 = arith.mulf %17, %21 : vector<16x16x128xf32>
    %23 = arith.addf %16, %22 : vector<16x16x128xf32>
    %24 = vector.extract_strided_slice %7 {offsets = [0, 0, 0], sizes = [16, 16, 128], strides = [1, 1, 1]} : vector<18x16x128xf32> to vector<16x16x128xf32>
    %25 = vector.extract_strided_slice %8 {offsets = [0, 2, 0], sizes = [1, 1, 128], strides = [1, 1, 1]} : vector<3x3x128xf32> to vector<1x1x128xf32>
    %26 = vector.shape_cast %25 : vector<1x1x128xf32> to vector<128xf32>
    %27 = vector.shape_cast %26 : vector<128xf32> to vector<1x1x128xf32>
    %28 = vector.broadcast %27 : vector<1x1x128xf32> to vector<16x16x128xf32>
    %29 = arith.mulf %24, %28 : vector<16x16x128xf32>
    %30 = arith.addf %23, %29 : vector<16x16x128xf32>
    %31 = vector.extract_strided_slice %5 {offsets = [1, 0, 0], sizes = [16, 16, 128], strides = [1, 1, 1]} : vector<18x16x128xf32> to vector<16x16x128xf32>
    %32 = vector.extract_strided_slice %8 {offsets = [1, 0, 0], sizes = [1, 1, 128], strides = [1, 1, 1]} : vector<3x3x128xf32> to vector<1x1x128xf32>
    %33 = vector.shape_cast %32 : vector<1x1x128xf32> to vector<128xf32>
    %34 = vector.shape_cast %33 : vector<128xf32> to vector<1x1x128xf32>
    %35 = vector.broadcast %34 : vector<1x1x128xf32> to vector<16x16x128xf32>
    %36 = arith.mulf %31, %35 : vector<16x16x128xf32>
    %37 = arith.addf %30, %36 : vector<16x16x128xf32>
    %38 = vector.extract_strided_slice %6 {offsets = [1, 0, 0], sizes = [16, 16, 128], strides = [1, 1, 1]} : vector<18x16x128xf32> to vector<16x16x128xf32>
    %39 = vector.extract_strided_slice %8 {offsets = [1, 1, 0], sizes = [1, 1, 128], strides = [1, 1, 1]} : vector<3x3x128xf32> to vector<1x1x128xf32>
    %40 = vector.shape_cast %39 : vector<1x1x128xf32> to vector<128xf32>
    %41 = vector.shape_cast %40 : vector<128xf32> to vector<1x1x128xf32>
    %42 = vector.broadcast %41 : vector<1x1x128xf32> to vector<16x16x128xf32>
    %43 = arith.mulf %38, %42 : vector<16x16x128xf32>
    %44 = arith.addf %37, %43 : vector<16x16x128xf32>
    %45 = vector.extract_strided_slice %7 {offsets = [1, 0, 0], sizes = [16, 16, 128], strides = [1, 1, 1]} : vector<18x16x128xf32> to vector<16x16x128xf32>
    %46 = vector.extract_strided_slice %8 {offsets = [1, 2, 0], sizes = [1, 1, 128], strides = [1, 1, 1]} : vector<3x3x128xf32> to vector<1x1x128xf32>
    %47 = vector.shape_cast %46 : vector<1x1x128xf32> to vector<128xf32>
    %48 = vector.shape_cast %47 : vector<128xf32> to vector<1x1x128xf32>
    %49 = vector.broadcast %48 : vector<1x1x128xf32> to vector<16x16x128xf32>
    %50 = arith.mulf %45, %49 : vector<16x16x128xf32>
    %51 = arith.addf %44, %50 : vector<16x16x128xf32>
    %52 = vector.extract_strided_slice %5 {offsets = [2, 0, 0], sizes = [16, 16, 128], strides = [1, 1, 1]} : vector<18x16x128xf32> to vector<16x16x128xf32>
    %53 = vector.extract_strided_slice %8 {offsets = [2, 0, 0], sizes = [1, 1, 128], strides = [1, 1, 1]} : vector<3x3x128xf32> to vector<1x1x128xf32>
    %54 = vector.shape_cast %53 : vector<1x1x128xf32> to vector<128xf32>
    %55 = vector.shape_cast %54 : vector<128xf32> to vector<1x1x128xf32>
    %56 = vector.broadcast %55 : vector<1x1x128xf32> to vector<16x16x128xf32>
    %57 = arith.mulf %52, %56 : vector<16x16x128xf32>
    %58 = arith.addf %51, %57 : vector<16x16x128xf32>
    %59 = vector.extract_strided_slice %6 {offsets = [2, 0, 0], sizes = [16, 16, 128], strides = [1, 1, 1]} : vector<18x16x128xf32> to vector<16x16x128xf32>
    %60 = vector.extract_strided_slice %8 {offsets = [2, 1, 0], sizes = [1, 1, 128], strides = [1, 1, 1]} : vector<3x3x128xf32> to vector<1x1x128xf32>
    %61 = vector.shape_cast %60 : vector<1x1x128xf32> to vector<128xf32>
    %62 = vector.shape_cast %61 : vector<128xf32> to vector<1x1x128xf32>
    %63 = vector.broadcast %62 : vector<1x1x128xf32> to vector<16x16x128xf32>
    %64 = arith.mulf %59, %63 : vector<16x16x128xf32>
    %65 = arith.addf %58, %64 : vector<16x16x128xf32>
    %66 = vector.extract_strided_slice %7 {offsets = [2, 0, 0], sizes = [16, 16, 128], strides = [1, 1, 1]} : vector<18x16x128xf32> to vector<16x16x128xf32>
    %67 = vector.extract_strided_slice %8 {offsets = [2, 2, 0], sizes = [1, 1, 128], strides = [1, 1, 1]} : vector<3x3x128xf32> to vector<1x1x128xf32>
    %68 = vector.shape_cast %67 : vector<1x1x128xf32> to vector<128xf32>
    %69 = vector.shape_cast %68 : vector<128xf32> to vector<1x1x128xf32>
    %70 = vector.broadcast %69 : vector<1x1x128xf32> to vector<16x16x128xf32>
    %71 = arith.mulf %66, %70 : vector<16x16x128xf32>
    %72 = arith.addf %65, %71 : vector<16x16x128xf32>
    %73 = vector.shape_cast %72 : vector<16x16x128xf32> to vector<256x128xf32>
    %c0_5 = arith.constant 0 : index
    %c0_6 = arith.constant 0 : index
    %74 = vector.load %arg4[%c0_5, %c0_6] : memref<128x128xf32, #tpu.memory_space<vmem>>, vector<128x128xf32>
    %cst_7 = arith.constant dense<0.000000e+00> : vector<256x128xf32>
    %75 = tpu.matmul %73, %74, %cst_7 {dimension_numbers = #tpu.dot_dimension_numbers<[1], [0], [0], [1], [0, 0, 1, 1], [], []>} : vector<256x128xf32>, vector<128x128xf32>, vector<256x128xf32> -> vector<256x128xf32>
    %c0_8 = arith.constant 0 : index
    %c0_9 = arith.constant 0 : index
    %76 = vector.load %arg5[%c0_8, %c0_9] : memref<1x128xf32, #tpu.memory_space<vmem>>, vector<1x128xf32>
    %77 = vector.broadcast %76 : vector<1x128xf32> to vector<256x128xf32>
    %78 = arith.addf %75, %77 : vector<256x128xf32>
    %79 = vector.shape_cast %78 : vector<256x128xf32> to vector<16x16x128xf32>
    %c0_10 = arith.constant 0 : index
    %c0_11 = arith.constant 0 : index
    %c0_12 = arith.constant 0 : index
    %c0_13 = arith.constant 0 : index
    %80 = vector.load %arg6[%c0_10, %c0_11, %c0_12, %c0_13] : memref<1x16x16x128xf32, #tpu.memory_space<vmem>>, vector<1x16x16x128xf32>
    %81 = vector.shape_cast %80 : vector<1x16x16x128xf32> to vector<16x16x128xf32>
    %82 = vector.shape_cast %79 : vector<16x16x128xf32> to vector<1x16x16x128xf32>
    tpu.vector_store %arg6[%c0_10, %c0_11, %c0_12, %c0_13], %82 {strides = array<i32>} : memref<1x16x16x128xf32, #tpu.memory_space<vmem>>, vector<1x16x16x128xf32>,
    return
  }
  func.func @transform_0(%arg0: i32, %arg1: i32) -> (i32, i32, i32, i32) {
    %c0_i32 = arith.constant 0 : i32
    %c0_i32_0 = arith.constant 0 : i32
    %c0_i32_1 = arith.constant 0 : i32
    %c0_i32_2 = arith.constant 0 : i32
    return %arg0, %c0_i32, %c0_i32_0, %c0_i32_1 : i32, i32, i32, i32
  }
  func.func @transform_1(%arg0: i32, %arg1: i32) -> (i32, i32, i32) {
    %c0_i32 = arith.constant 0 : i32
    %c0_i32_0 = arith.constant 0 : i32
    %c0_i32_1 = arith.constant 0 : i32
    %c0_i32_2 = arith.constant 0 : i32
    return %c0_i32, %c0_i32_0, %c0_i32_1 : i32, i32, i32
  }
  func.func @transform_2(%arg0: i32, %arg1: i32) -> (i32, i32) {
    %c0_i32 = arith.constant 0 : i32
    %c0_i32_0 = arith.constant 0 : i32
    %c0_i32_1 = arith.constant 0 : i32
    return %c0_i32, %c0_i32_0 : i32, i32
  }
  func.func @transform_3(%arg0: i32, %arg1: i32) -> (i32, i32) {
    %c0_i32 = arith.constant 0 : i32
    %c0_i32_0 = arith.constant 0 : i32
    %c0_i32_1 = arith.constant 0 : i32
    return %c0_i32, %c0_i32_0 : i32, i32
  }
  func.func @transform_4(%arg0: i32, %arg1: i32) -> (i32, i32, i32, i32) {
    %c0_i32 = arith.constant 0 : i32
    %c0_i32_0 = arith.constant 0 : i32
    %c0_i32_1 = arith.constant 0 : i32
    return %arg0, %arg1, %c0_i32, %c0_i32_0 : i32, i32, i32, i32
  }
}

</mosaic_0001>

<bundles_post_ra>
// kernel: tpu_custom_call.1
= control target key start
LH: loop header
LB: loop body
LE: loop exit
PB: predicated region body
PF: predicated region fallthrough
CT: control target
= control target key end

     0   :  { %9 = vsyncpa [#allocation3], 0  ;;  %s4487_s0 = inlined_call_operand.vmem [shape: f32[2,18,18,128], index: 0, kind: input, shape index: {}]   ;;  %s4488_s1 = inlined_call_operand.vmem [shape: f32[3,3,128], index: 1, kind: input, shape index: {}]   ;;  %s4489_s2 = inlined_call_operand.vmem [shape: f32[128,128], index: 2, kind: input, shape index: {}]   ;;  %s4490_s3 = inlined_call_operand.vmem [shape: f32[1,128], index: 3, kind: input, shape index: {}]   ;;  %s4491_s4 = inlined_call_operand.hbm [shape: f32[2,16,16,128], index: 4, kind: output, shape index: {}]  }
   0x1   :  { %11 = vsyncpa [#allocation3 + $0x1], 0  ;;  %s2443_s15 = smov 0   ;;  %s2445_s16 = smov 0  }
   0x2   :  { %s2447_s17 = smov 0   ;;  %s2449_s18 = smov 0  }
   0x3   :  { %s2451_s19 = smov 0   ;;  %s2453_s20 = smov 0  }
   0x4 LB: > { %s2173_s21 = sadd.s32 4294967295, %s2414_s20   ;;  %s2174_s22 = sadd.s32 4294967294, %s2414_s20   ;;  %s2414_s20 = sphi %s2453_s20, %s17_s20   ;;  %s2410_s19 = sphi %s2451_s19, %s4856_s19   ;;  %s2406_s18 = sphi %s2449_s18, %s4855_s18   ;;  %s2402_s17 = sphi %s2447_s17, %s4854_s17   ;;  %s2398_s16 = sphi %s2445_s16, %s4853_s16   ;;  %s2394_s15 = sphi %s2443_s15, %s4852_s15  }
   0x5   : > { %s29_s23 = sadd.s32 1, %s2410_s19  ;;  %s127_s24 = sadd.s32 1, %s2402_s17 }
   0x6   : > { %p31_p0 = scmp.ge.s32.totalorder %s29_s23, 2  ;;  %p137_p1 = scmp.ne.s32.totalorder %s2402_s17, %s2398_s16 }
   0x7   : > { %p138_p2 = scmp.eq.s32.totalorder %s2173_s21, 1  ;;  %p143_p3 = scmp.ne.s32.totalorder %s2398_s16, %s2394_s15 }
   0x8   : > { %s4858_s23 = smov (%p31_p0, %s29_s23), 0  ;;  %p144_p5 = scmp.eq.s32.totalorder %s2174_s22, 1 }
   0x9   : > { %p2483_p4 = por %p138_p2, %p137_p1  ;;  %s122_s26 = ssub.s32 %s2410_s19, %s4858_s23 }
   0xa   : > { %p2177_p6 = scmp.ge.s32.totalorder %s2414_s20, 1  ;;  %p125_p7 = scmp.eq.s32.totalorder %s122_s26, 0 }
   0xb   : > { %p2490_p8 = por %p144_p5, %p143_p3  ;;  %p179_p9 = scmp.lt.s32.totalorder %s2414_s20, 3 }
   0xc   : > { %s2496_s28 = scalar_select %p125_p7, %s2402_s17, %s127_s24  }
   0xd   : > { %p180_p10 = pnand %p2177_p6, %p179_p9 }
   0xf   : > { %183 = sbr.rel (%p180_p10) target bundleno = 476 (0x1dc), region = 36 }
  0x14   : > { %v1929_v0 = vld [vmem:[%s4489_s2 + $0x78] sm:$0xff]  ;;  %v1928_v1 = vld [vmem:[%s4489_s2 + $0x70] sm:$0xff]  ;;  %p205_p11 = scmp.lt.s32.totalorder %s2406_s18, 1  ;;  %v1927_v2 = vld [vmem:[%s4489_s2 + $0x68] sm:$0xff]  ;;  %vm433_vm0 = vcmask 1046528   ;;  %vm675_vm1 = vcmask 1045504  }
  0x15   : > { %2187 = vmatpush.msra.mxu2 %v1929_v0  ;;  %2188 = vmatpush.msra.mxu3 %v1929_v0  ;;  %v1926_v3 = vld [vmem:[%s4489_s2 + $0x60] sm:$0xff]  ;;  %v1925_v4 = vld [vmem:[%s4489_s2 + $0x58] sm:$0xff]  ;;  %v270_v7 = vld [vmem:[%s4488_s1 + $0x8] sm:$0x7]  ;;  %s202_s21 = sand.u32 1, %s2398_s16   ;;  %s2185_s29 = sshll.u32 %s2406_s18, 8 }
  0x16   : > { %1934 = vmatpush.msra.mxu0 %v1929_v0  ;;  %2186 = vmatpush.msra.mxu1 %v1929_v0  ;;  %s206_s9 = scalar_select %p205_p11, %s2406_s18, 1  ;;  %v268_v5 = vld [vmem:[%s4488_s1] sm:$0x7]  ;;  %v269_v6 = vld [vmem:[%s4488_s1 + $0x4] sm:$0x7]  ;;  %v2548_v17 = vperm.slane %v270_v7, 0 }
  0x17   : > { %2190 = vmatpush.msra.mxu2 %v1928_v1  ;;  %2191 = vmatpush.msra.mxu3 %v1928_v1  ;;  %v2529_v8 = vperm.slane %v268_v5, 0  ;;  %v2531_v9 = vperm.slane %v268_v5, 1  ;;  %v2533_v10 = vperm.slane %v268_v5, 2  ;;  %v2535_v11 = vperm.slane %v269_v6, 0  ;;  %v1924_v18 = vld [vmem:[%s4489_s2 + $0x50] sm:$0xff]  ;;  %v1923_v29 = vld [vmem:[%s4489_s2 + $0x48] sm:$0xff]  ;;  %s2094_s7 = scalar_lea.hbm %s4491_s4, %s2185_s29 }
  0x18   : > { %1935 = vmatpush.msra.mxu0 %v1928_v1  ;;  %2189 = vmatpush.msra.mxu1 %v1928_v1  ;;  %s2234_s12 = smul.u32 432, %s206_s9  ;;  %v2544_v15 = vperm.slane %v269_v6, 1  ;;  %v2546_v16 = vperm.slane %v269_v6, 2  ;;  %v2562_v23 = vperm.slane %v270_v7, 1  ;;  %v2574_v28 = vperm.slane %v270_v7, 2  ;;  %v1922_v39 = vld [vmem:[%s4489_s2 + $0x40] sm:$0xff] }
  0x19   : > { %2193 = vmatpush.msra.mxu2 %v1927_v2  ;;  %2194 = vmatpush.msra.mxu3 %v1927_v2  ;;  %v1921_v48 = vld [vmem:[%s4489_s2 + $0x38] sm:$0xff]  ;;  %v1920_v57 = vld [vmem:[%s4489_s2 + $0x30] sm:$0xff]  ;;  %s2178_s22 = sshll.u32 %s202_s21, 8  ;;  %s2097_s9 = sshll.u32 %s2094_s7, 4  ;;  %s2098_s9 = int_to_ptr.hbm [resolvable:$true] %s2097_s9 }
  0x1a   : > { %1936 = vmatpush.msra.mxu0 %v1927_v2  ;;  %2192 = vmatpush.msra.mxu1 %v1927_v2  ;;  %s2524_s5 = scalar_lea.vmem %s4487_s0, %s2234_s12  ;;  %s2080_s18 = scalar_lea.sflag [#allocation3], %s202_s21 }
  0x1b   : > { %2196 = vmatpush.msra.mxu2 %v1926_v3  ;;  %2197 = vmatpush.msra.mxu3 %v1926_v3  ;;  %v238_v12 = vld [vmem:[%s2524_s5 + $0xc0] sm:$0xff]  ;;  %v2539_v13 = vld [vmem:[%s2524_s5 + $0xc8] sm:$0xff]  ;;  %v2542_v14 = vld [vmem:[%s2524_s5 + $0xd8] sm:$0xff]  ;;  %s2350_s10 = sshra.s32 %s2098_s9, 4  ;;  %s2356_s14 = scalar_lea.hbm %s4491_s4, 512  ;;  %s2351_s10 = int_to_ptr.hbm [resolvable:$true] %s2350_s10 }
  0x1c   : > { %4656 = vst [vmem:[#allocation5_spill] sm:$0xff] %v2542_v14  ;;  %1937 = vmatpush.msra.mxu0 %v1926_v3  ;;  %2195 = vmatpush.msra.mxu1 %v1926_v3  ;;  %v2554_v19 = vld [vmem:[%s2524_s5 + $0xe0] sm:$0xff]  ;;  %v288_v20 = vmul.f32 %v2529_v8, %v238_v12  ;;  %v361_v21 = vmul.f32 %v2531_v9, %v238_v12  ;;  %v2565_v24 = vld [vmem:[%s2524_s5 + $0xf0] sm:$0xff]  ;;  %v2587_v34 = vld [vmem:[%s2524_s5 + $0xf8] sm:$0xff]  ;;  %s2352_s11 = scalar_lea.hbm %s2351_s10, 256  ;;  %p2357_p1 = scmp.lt.s32.totalorder %s2351_s10, %s4491_s4 }
  0x1d   : > { %4657 = vst [vmem:[#allocation6_spill] sm:$0xff] %v2554_v19  ;;  %v2560_v22 = vmul.f32 %v2531_v9, %v2539_v13  ;;  %2199 = vmatpush.msra.mxu2 %v1925_v4  ;;  %2200 = vmatpush.msra.mxu3 %v1925_v4  ;;  %v603_v25 = vmul.f32 %v2533_v10, %v238_v12  ;;  %v250_v52 = vld [vmem:[%s2524_s5 + $0x120] sm:$0xff]  ;;  %v2625_v53 = vld [vmem:[%s2524_s5 + $0x128] sm:$0xff]  ;;  %v2641_v61 = vld [vmem:[%s2524_s5 + $0x138] sm:$0xff]  ;;  %p2353_p12 = scmp.ne.s32.totalorder %s2351_s10, %s2352_s11  ;;  %p2358_p2 = scmp.lt.s32.totalorder %s2356_s14, %s2352_s11 }
  0x1e   : > { %4658 = vst [vmem:[#allocation7_spill] sm:$0xff] %v2565_v24  ;;  %v2570_v26 = vmul.f32 %v2533_v10, %v2539_v13  ;;  %v837_v27 = vmul.f32 %v2535_v11, %v2542_v14  ;;  %1938 = vmatpush.msra.mxu0 %v1925_v4  ;;  %2198 = vmatpush.msra.mxu1 %v1925_v4  ;;  %v474_v30 = vrot.slane %v361_v21, 1  ;;  %v1919_v3 = vld [vmem:[%s4489_s2 + $0x28] sm:$0xff]  ;;  %v2657_v6 = vld [vmem:[%s2524_s5 + $0x140] sm:$0xff] }
  0x1f   : > { %v4508_v31 = vrot.slane %v2560_v22, 1  ;;  %v910_v32 = vmul.f32 %v2544_v15, %v2542_v14  ;;  %v2584_v33 = vmul.f32 %v2544_v15, %v2554_v19  ;;  %2202 = vmatpush.msra.mxu2 %v1924_v18  ;;  %2203 = vmatpush.msra.mxu3 %v1924_v18  ;;  %4659 = vst [vmem:[#allocation8_spill] sm:$0xff] %v2587_v34  ;;  %v716_v35 = vrot.slane %v603_v25, 2  ;;  %p2354_p13 = pnand %p2353_p12, %p2483_p4  ;;  %p2359_p3 = por %p2358_p2, %p2357_p1 }
  0x20   : > { %v4506_v36 = vrot.slane %v2570_v26, 2  ;;  %v1151_v37 = vmul.f32 %v2546_v16, %v2542_v14  ;;  %v2594_v38 = vmul.f32 %v2546_v16, %v2554_v19  ;;  %1939 = vmatpush.msra.mxu0 %v1924_v18  ;;  %2201 = vmatpush.msra.mxu1 %v1924_v18  ;;  %v2605_v43 = vmul.f32 %v2548_v17, %v2565_v24 }
  0x21   : > { %v476_v40 = vsel %vm433_vm0, %v474_v30, %v4508_v31  ;;  %v1022_v41 = vrot.slane %v910_v32, 1  ;;  %v4505_v42 = vrot.slane %v2584_v33, 1  ;;  %2205 = vmatpush.msra.mxu2 %v1923_v29  ;;  %2206 = vmatpush.msra.mxu3 %v1923_v29  ;;  %v1457_v50 = vmul.f32 %v2562_v23, %v2565_v24  ;;  %4660 = vst [vmem:[#allocation9_spill] sm:$0xff] %v2641_v61  ;;  %v2674_v30 = vld [vmem:[%s2524_s5 + $0x150] sm:$0xff]  ;;  %p2355_p0 = pneg %p2354_p13 }
  0x22   : > { %v562_v44 = vadd.f32 %v476_v40, %v288_v20  ;;  %v718_v45 = vsel %vm675_vm1, %v716_v35, %v4506_v36  ;;  %v1263_v46 = vrot.slane %v1151_v37, 2  ;;  %v4502_v47 = vrot.slane %v2594_v38, 2  ;;  %1940 = vmatpush.msra.mxu0 %v1923_v29  ;;  %2204 = vmatpush.msra.mxu1 %v1923_v29  ;;  %4661 = vst [vmem:[#allocation10_spill] sm:$0xff] %v2674_v30  ;;  %v2680_v40 = vld [vmem:[%s2524_s5 + $0x158] sm:$0xff] }
  0x23   : > { %v1024_v49 = vsel %vm433_vm0, %v1022_v41, %v4505_v42  ;;  %v2621_v51 = vmul.f32 %v2562_v23, %v2587_v34  ;;  %2208 = vmatpush.msra.mxu2 %v1922_v39  ;;  %2209 = vmatpush.msra.mxu3 %v1922_v39  ;;  %v1698_v56 = vmul.f32 %v2574_v28, %v2565_v24  ;;  %v1569_v58 = vrot.slane %v1457_v50, 1  ;;  %p2360_p5 = pnand %p2359_p3, %p2355_p0 }
  0x24   : > { %v804_v54 = vadd.f32 %v718_v45, %v562_v44  ;;  %v1265_v55 = vsel %vm675_vm1, %v1263_v46, %v4502_v47  ;;  %1941 = vmatpush.msra.mxu0 %v1922_v39  ;;  %2207 = vmatpush.msra.mxu1 %v1922_v39  ;;  %v2638_v60 = vmul.f32 %v2574_v28, %v2587_v34  ;;  %v1917_v45 = vld [vmem:[%s4489_s2 + $0x18] sm:$0xff] }
  0x25   : > { %v4501_v59 = vrot.slane %v2621_v51, 1  ;;  %v296_v62 = vmul.f32 %v2529_v8, %v250_v52  ;;  %2211 = vmatpush.msra.mxu2 %v1921_v48  ;;  %2212 = vmatpush.msra.mxu3 %v1921_v48  ;;  %v1810_v0 = vrot.slane %v1698_v56, 2  ;;  %v373_v1 = vmul.f32 %v2531_v9, %v250_v52 }
  0x26   : > { %v869_v63 = vadd.f32 %v837_v27, %v804_v54  ;;  %v2647_v2 = vmul.f32 %v2531_v9, %v2625_v53  ;;  %1942 = vmatpush.msra.mxu0 %v1921_v48  ;;  %2210 = vmatpush.msra.mxu1 %v1921_v48  ;;  %v4498_v5 = vrot.slane %v2638_v60, 2  ;;  %v615_v7 = vmul.f32 %v2533_v10, %v250_v52  ;;  %v1918_v27 = vld [vmem:[%s4489_s2 + $0x20] sm:$0xff] }
  0x27   : > { %v1571_v4 = vsel %vm433_vm0, %v1569_v58, %v4501_v59  ;;  %v2662_v12 = vmul.f32 %v2533_v10, %v2625_v53  ;;  %2214 = vmatpush.msra.mxu2 %v1920_v57  ;;  %2215 = vmatpush.msra.mxu3 %v1920_v57  ;;  %v494_v20 = vrot.slane %v373_v1, 1  ;;  %v845_v25 = vmul.f32 %v2535_v11, %v2641_v61 }
  0x28   : > { %v1110_v18 = vadd.f32 %v1024_v49, %v869_v63  ;;  %v4497_v21 = vrot.slane %v2647_v2, 1  ;;  %1943 = vmatpush.msra.mxu0 %v1920_v57  ;;  %2213 = vmatpush.msra.mxu1 %v1920_v57  ;;  %v1812_v29 = vsel %vm675_vm1, %v1810_v0, %v4498_v5  ;;  %v736_v32 = vrot.slane %v615_v7, 2  ;;  %v1916_v57 = vld [vmem:[%s4489_s2 + $0x10] sm:$0xff] }
  0x29   : > { %v4496_v35 = vrot.slane %v2662_v12, 2  ;;  %v922_v37 = vmul.f32 %v2544_v15, %v2641_v61  ;;  %2217 = vmatpush.msra.mxu2 %v1919_v3  ;;  %2218 = vmatpush.msra.mxu3 %v1919_v3  ;;  %v2687_v44 = vmul.f32 %v2544_v15, %v2657_v6  ;;  %v1163_v50 = vmul.f32 %v2546_v16, %v2641_v61 }
  0x2a   : > { %v1351_v39 = vadd.f32 %v1265_v55, %v1110_v18  ;;  %v496_v41 = vsel %vm433_vm0, %v494_v20, %v4497_v21  ;;  %1944 = vmatpush.msra.mxu0 %v1919_v3  ;;  %2216 = vmatpush.msra.mxu1 %v1919_v3  ;;  %v2701_v55 = vmul.f32 %v2546_v16, %v2657_v6  ;;  %v214_v18 = vld [vmem:[%s2524_s5] sm:$0xff]  ;;  %v1915_v20 = vld [vmem:[%s4489_s2 + $0x8] sm:$0xff] }
  0x2b   : > { %v570_v46 = vadd.f32 %v496_v41, %v296_v62  ;;  %v738_v48 = vsel %vm675_vm1, %v736_v32, %v4496_v35  ;;  %v1042_v49 = vrot.slane %v922_v37, 1  ;;  %2220 = vmatpush.msra.mxu2 %v1918_v27  ;;  %2221 = vmatpush.msra.mxu3 %v1918_v27  ;;  %v4495_v54 = vrot.slane %v2687_v44, 1 }
  0x2c   : > { %v1416_v52 = vadd.f32 %v2605_v43, %v1351_v39  ;;  %v1392_v56 = vmul.f32 %v2548_v17, %v2674_v30  ;;  %1945 = vmatpush.msra.mxu0 %v1918_v27  ;;  %2219 = vmatpush.msra.mxu1 %v1918_v27  ;;  %v1283_v62 = vrot.slane %v1163_v50, 2  ;;  %v1469_v43 = vmul.f32 %v2562_v23, %v2674_v30  ;;  %v2730_v39 = vld [vmem:[%s2524_s5 + $0x8] sm:$0xff] }
  0x2d   : > { %v812_v58 = vadd.f32 %v738_v48, %v570_v46  ;;  %v2712_v63 = vmul.f32 %v2562_v23, %v2680_v40  ;;  %2223 = vmatpush.msra.mxu2 %v1917_v45  ;;  %2224 = vmatpush.msra.mxu3 %v1917_v45  ;;  %v1044_v1 = vsel %vm433_vm0, %v1042_v49, %v4495_v54  ;;  %v4493_v3 = vrot.slane %v2701_v55, 2  ;;  %v1914_v49 = vld [vmem:[%s4489_s2] sm:$0xff] }
  0x2e   : > { %v1657_v0 = vadd.f32 %v1571_v4, %v1416_v52  ;;  %v1710_v7 = vmul.f32 %v2574_v28, %v2674_v30  ;;  %1946 = vmatpush.msra.mxu0 %v1917_v45  ;;  %2222 = vmatpush.msra.mxu1 %v1917_v45  ;;  %v1589_v32 = vrot.slane %v1469_v43, 1  ;;  %v2727_v37 = vmul.f32 %v2574_v28, %v2680_v40  ;;  %v2736_v45 = vld [vmem:[%s2524_s5 + $0x18] sm:$0xff] }
  0x2f   : > { %v877_v27 = vadd.f32 %v845_v25, %v812_v58  ;;  %v4492_v4 = vrot.slane %v2712_v63, 1  ;;  %2226 = vmatpush.msra.mxu2 %v1916_v57  ;;  %2227 = vmatpush.msra.mxu3 %v1916_v57  ;;  %v1285_v46 = vsel %vm675_vm1, %v1283_v62, %v4493_v3  ;;  %4662 = vst [vmem:[#allocation11_spill] sm:$0xff] %v2736_v45  ;;  %v2748_v62 = vld [vmem:[%s2524_s5 + $0x20] sm:$0xff] }
  0x30   : > { %v1898_v41 = vadd.f32 %v1812_v29, %v1657_v0  ;;  %v1830_v48 = vrot.slane %v1710_v7, 2  ;;  %v272_v25 = vmul.f32 %v2529_v8, %v214_v18  ;;  %v4494_v29 = vrot.slane %v2727_v37, 2  ;;  %1947 = vmatpush.msra.mxu0 %v1916_v57  ;;  %2225 = vmatpush.msra.mxu1 %v1916_v57 }
  0x31   : > { %v1118_v50 = vadd.f32 %v1044_v1, %v877_v27  ;;  %v1591_v52 = vsel %vm433_vm0, %v1589_v32, %v4492_v4  ;;  %v337_v58 = vmul.f32 %v2531_v9, %v214_v18  ;;  %2229 = vmatpush.msra.mxu2 %v1915_v20  ;;  %2230 = vmatpush.msra.mxu3 %v1915_v20 }
  0x32   : > { %v2752_v43 = vmul.f32 %v2531_v9, %v2730_v39  ;;  %v579_v0 = vmul.f32 %v2533_v10, %v214_v18  ;;  %v2757_v1 = vmul.f32 %v2533_v10, %v2730_v39  ;;  %v1832_v57 = vsel %vm675_vm1, %v1830_v48, %v4494_v29  ;;  %1948 = vmatpush.msra.mxu0 %v1915_v20  ;;  %v2769_v48 = vld [vmem:[%s2524_s5 + $0x30] sm:$0xff] }
  0x33   : > { %v1359_v7 = vadd.f32 %v1285_v46, %v1118_v50  ;;  %2228 = vmatpush.msra.mxu1 %v1915_v20  ;;  %v434_v27 = vrot.slane %v337_v58, 1  ;;  %v821_v32 = vmul.f32 %v2535_v11, %v2736_v45  ;;  %2232 = vmatpush.msra.mxu2 %v1914_v49  ;;  %v886_v46 = vmul.f32 %v2544_v15, %v2736_v45  ;;  %v2772_v20 = vld [vmem:[%s2524_s5 + $0x38] sm:$0xff] }
  0x34   : > { %2233 = vmatpush.msra.mxu3 %v1914_v49  ;;  %v4500_v18 = vrot.slane %v2752_v43, 1  ;;  %v676_v4 = vrot.slane %v579_v0, 2  ;;  %v4499_v3 = vrot.slane %v2757_v1, 2  ;;  %1998 = vmatmul.f32.vlgmr.msra.gmra.mxu2 %v1898_v41  ;;  %4663 = vst [vmem:[#allocation12_spill] sm:$0xff] %v2769_v48  ;;  %v2776_v58 = vmul.f32 %v2544_v15, %v2748_v62 }
  0x35   : > { %v1424_v50 = vadd.f32 %v1392_v56, %v1359_v7  ;;  %1949 = vmatpush.msra.mxu0 %v1914_v49  ;;  %v1127_v0 = vmul.f32 %v2546_v16, %v2736_v45  ;;  %2231 = vmatpush.msra.mxu1 %v1914_v49  ;;  %v982_v41 = vrot.slane %v886_v46, 1  ;;  %v2788_v7 = vmul.f32 %v2546_v16, %v2748_v62 }
  0x36   : > { %v436_v29 = vsel %vm433_vm0, %v434_v27, %v4500_v18  ;;  %v678_v56 = vsel %vm675_vm1, %v676_v4, %v4499_v3  ;;  %v4503_v21 = vrot.slane %v2776_v58, 1  ;;  %v1368_v27 = vmul.f32 %v2548_v17, %v2769_v48  ;;  %v226_v3 = vld [vmem:[%s2524_s5 + $0x60] sm:$0xff] }
  0x37   : > { %v1665_v54 = vadd.f32 %v1591_v52, %v1424_v50  ;;  %v546_v35 = vadd.f32 %v436_v29, %v272_v25  ;;  %v1223_v49 = vrot.slane %v1127_v0, 2  ;;  %v4504_v5 = vrot.slane %v2788_v7, 2  ;;  %v2807_v50 = vld [vmem:[%s2524_s5 + $0x68] sm:$0xff] }
  0x38   : > { %v1433_v4 = vmul.f32 %v2562_v23, %v2769_v48  ;;  %v2798_v46 = vmul.f32 %v2562_v23, %v2772_v20  ;;  %v984_v25 = vsel %vm433_vm0, %v982_v41, %v4503_v21  ;;  %v1674_v29 = vmul.f32 %v2574_v28, %v2769_v48 }
  0x39   : > { %v1906_v18 = vadd.f32 %v1832_v57, %v1665_v54  ;;  %v788_v52 = vadd.f32 %v678_v56, %v546_v35  ;;  %v1225_v0 = vsel %vm675_vm1, %v1223_v49, %v4504_v5  ;;  %v2815_v35 = vmul.f32 %v2574_v28, %v2772_v20  ;;  %v2818_v54 = vld [vmem:[%s2524_s5 + $0x78] sm:$0xff]  ;;  %v2827_v5 = vld [vmem:[%s2524_s5 + $0x80] sm:$0xff] }
  0x3a   : > { %v1529_v59 = vrot.slane %v1433_v4, 1  ;;  %v4507_v47 = vrot.slane %v2798_v46, 1  ;;  %4664 = vst [vmem:[#allocation13_spill] sm:$0xff] %v2818_v54  ;;  %v1770_v56 = vrot.slane %v1674_v29, 2  ;;  %v280_v41 = vmul.f32 %v2529_v8, %v226_v3 }
  0x3b   : > { %2022 = vmatmul.f32.vlgmr.msra.gmra.mxu3 %v1906_v18  ;;  %v853_v57 = vadd.f32 %v821_v32, %v788_v52  ;;  %v349_v21 = vmul.f32 %v2531_v9, %v226_v3  ;;  %v4515_v4 = vrot.slane %v2815_v35, 2  ;;  %v2831_v42 = vmul.f32 %v2531_v9, %v2807_v50  ;;  %v2835_v52 = vld [vmem:[%s2524_s5 + $0x90] sm:$0xff] }
  0x3c   : > { %v1531_v49 = vsel %vm433_vm0, %v1529_v59, %v4507_v47  ;;  %v591_v32 = vmul.f32 %v2533_v10, %v226_v3  ;;  %4666 = vst [vmem:[#allocation15_spill] sm:$0xff] %v2835_v52  ;;  %v2839_v36 = vmul.f32 %v2533_v10, %v2807_v50  ;;  %v829_v59 = vmul.f32 %v2535_v11, %v2818_v54 }
  0x3d   : > { %4665 = vst [vmem:[#allocation14_spill] sm:$0xff] %v2831_v42  ;;  %v1094_v18 = vadd.f32 %v984_v25, %v853_v57  ;;  %v454_v29 = vrot.slane %v349_v21, 1  ;;  %v1772_v47 = vsel %vm675_vm1, %v1770_v56, %v4515_v4  ;;  %v4524_v31 = vrot.slane %v2831_v42, 1  ;;  %v2850_v57 = vld [vmem:[%s2524_s5 + $0x98] sm:$0xff] }
  0x3e   : > { %v696_v48 = vrot.slane %v591_v32, 2  ;;  %v898_v3 = vmul.f32 %v2544_v15, %v2818_v54  ;;  %v2855_v45 = vmul.f32 %v2544_v15, %v2827_v5  ;;  %v1139_v30 = vmul.f32 %v2546_v16, %v2818_v54 }
  0x3f   : > { %v1335_v25 = vadd.f32 %v1225_v0, %v1094_v18  ;;  %v456_v56 = vsel %vm433_vm0, %v454_v29, %v4524_v31  ;;  %v2864_v0 = vmul.f32 %v2546_v16, %v2827_v5  ;;  %v1376_v18 = vmul.f32 %v2548_v17, %v2835_v52 }
  0x40   : > { %v1002_v32 = vrot.slane %v898_v3, 1  ;;  %v554_v21 = vadd.f32 %v456_v56, %v280_v41  ;;  %v4668_v61 = vrot.slane %v2839_v36, 2  ;;  %v4526_v24 = vrot.slane %v2855_v45, 1 }
  0x41   : > { %4667 = vst [vmem:[#allocation16_spill] sm:$0xff] %v2864_v0  ;;  %v1400_v4 = vadd.f32 %v1368_v27, %v1335_v25  ;;  %v1243_v14 = vrot.slane %v1139_v30, 2  ;;  %v4529_v29 = vrot.slane %v2864_v0, 2  ;;  %v1445_v3 = vmul.f32 %v2562_v23, %v2835_v52  ;;  %v240_v30 = vld [vmem:[%s2524_s5 + $0xd0] sm:$0x3] }
  0x42   : > { %v698_v54 = vsel %vm675_vm1, %v696_v48, %v4668_v61  ;;  %v2877_v31 = vmul.f32 %v2562_v23, %v2850_v57  ;;  %v1004_v41 = vsel %vm433_vm0, %v1002_v32, %v4526_v24  ;;  %v1686_v61 = vmul.f32 %v2574_v28, %v2835_v52 }
  0x43   : > { %v1641_v42 = vadd.f32 %v1531_v49, %v1400_v4  ;;  %v796_v27 = vadd.f32 %v698_v54, %v554_v21  ;;  %v1245_v48 = vsel %vm675_vm1, %v1243_v14, %v4529_v29  ;;  %v1549_v25 = vrot.slane %v1445_v3, 1  ;;  %v2894_v54 = vld [vmem:[%s2524_s5 + $0xe8] sm:$0x3]  ;;  %v2903_v3 = vld [vmem:[%s2524_s5 + $0x100] sm:$0x3] }
  0x44   : > { %4669 = vst [vmem:[#allocation17_spill] sm:$0xff] %v2877_v31  ;;  %v4531_v56 = vrot.slane %v2877_v31, 1  ;;  %v2891_v49 = vmul.f32 %v2574_v28, %v2850_v57  ;;  %v1790_v32 = vrot.slane %v1686_v61, 2  ;;  %v289_v24 = vmul.f32 %v2529_v8, %v2539_v13 }
  0x45   : > { %4671 = vst [vmem:[#allocation19_spill] sm:$0xff] %v2894_v54  ;;  %v1882_v4 = vadd.f32 %v1772_v47, %v1641_v42  ;;  %v861_v21 = vadd.f32 %v829_v59, %v796_v27  ;;  %v363_v29 = vmul.f32 %v2531_v9, %v240_v30  ;;  %v605_v0 = vmul.f32 %v2533_v10, %v240_v30 }
  0x46   : > { %4670 = vst [vmem:[#allocation18_spill] sm:$0xff] %v2891_v49  ;;  %v1551_v52 = vsel %vm433_vm0, %v1549_v25, %v4531_v56  ;;  %v4538_v14 = vrot.slane %v2891_v49, 2  ;;  %v838_v47 = vmul.f32 %v2535_v11, %v2554_v19  ;;  %v912_v13 = vmul.f32 %v2544_v15, %v2894_v54  ;;  %v252_v19 = vld [vmem:[%s2524_s5 + $0x130] sm:$0x3] }
  0x47   : > { %4672 = vst [vmem:[#allocation20_spill] sm:$0xff] %v2903_v3  ;;  %1950 = vmatmul.f32.vlgmr.msra.gmra.mxu0 %v1882_v4  ;;  %v1102_v42 = vadd.f32 %v1004_v41, %v861_v21  ;;  %v1153_v59 = vmul.f32 %v2546_v16, %v2894_v54  ;;  %v477_v61 = vrot.slane %v363_v29, 1  ;;  %v719_v25 = vrot.slane %v605_v0, 2 }
  0x48   : > { %v1792_v27 = vsel %vm675_vm1, %v1790_v32, %v4538_v14  ;;  %v1385_v30 = vmul.f32 %v2548_v17, %v2587_v34  ;;  %v1025_v4 = vrot.slane %v912_v13, 1  ;;  %v1459_v56 = vmul.f32 %v2562_v23, %v2903_v3  ;;  %v2930_v32 = vld [vmem:[%s2524_s5 + $0x148] sm:$0x3] }
  0x49   : > { %v1343_v41 = vadd.f32 %v1245_v48, %v1102_v42  ;;  %v1266_v21 = vrot.slane %v1153_v59, 2  ;;  %v4673_v31 = vrot.slane %v2560_v22, 1  ;;  %v4674_v49 = vrot.slane %v2570_v26, 2 }
  0x4a   : > { %v1700_v0 = vmul.f32 %v2574_v28, %v2903_v3  ;;  %v297_v48 = vmul.f32 %v2529_v8, %v2625_v53  ;;  %v4675_v59 = vrot.slane %v2584_v33, 1  ;;  %v617_v14 = vmul.f32 %v2533_v10, %v252_v19  ;;  %v2943_v53 = vld [vmem:[%s2524_s5 + $0x160] sm:$0x3] }
  0x4b   : > { %v478_v54 = vsel %vm433_vm0, %v4673_v31, %v477_v61  ;;  %v720_v29 = vsel %vm675_vm1, %v4674_v49, %v719_v25  ;;  %v1408_v42 = vadd.f32 %v1376_v18, %v1343_v41  ;;  %v4676_v31 = vrot.slane %v2594_v38, 2 }
  0x4c   : > { %v563_v13 = vadd.f32 %v478_v54, %v289_v24  ;;  %v1026_v22 = vsel %vm433_vm0, %v4675_v59, %v1025_v4  ;;  %v1572_v61 = vrot.slane %v1459_v56, 1  ;;  %v1813_v49 = vrot.slane %v1700_v0, 2  ;;  %v216_v0 = vld [vmem:[%s2524_s5 + $0x10] sm:$0x3] }
  0x4d   : > { %v1267_v26 = vsel %vm675_vm1, %v4676_v31, %v1266_v21  ;;  %v375_v25 = vmul.f32 %v2531_v9, %v252_v19  ;;  %v1649_v3 = vadd.f32 %v1551_v52, %v1408_v42  ;;  %v846_v24 = vmul.f32 %v2535_v11, %v2657_v6 }
  0x4e   : > { %v805_v34 = vadd.f32 %v720_v29, %v563_v13  ;;  %v924_v33 = vmul.f32 %v2544_v15, %v2930_v32  ;;  %v4677_v38 = vrot.slane %v2621_v51, 1  ;;  %v4678_v56 = vrot.slane %v2638_v60, 2 }
  0x4f   : > { %v497_v41 = vrot.slane %v375_v25, 1  ;;  %v739_v19 = vrot.slane %v617_v14, 2  ;;  %v1890_v52 = vadd.f32 %v1792_v27, %v1649_v3  ;;  %v1165_v29 = vmul.f32 %v2546_v16, %v2930_v32 }
  0x50   : > { %v1573_v18 = vsel %vm433_vm0, %v4677_v38, %v1572_v61  ;;  %v1814_v54 = vsel %vm675_vm1, %v4678_v56, %v1813_v49  ;;  %v870_v4 = vadd.f32 %v838_v47, %v805_v34  ;;  %v1045_v21 = vrot.slane %v924_v33, 1  ;;  %v2974_v61 = vld [vmem:[%s2524_s5 + $0x28] sm:$0x3] }
  0x51   : > { %v4679_v42 = vrot.slane %v2647_v2, 1  ;;  %v4680_v13 = vrot.slane %v2662_v12, 2  ;;  %v1393_v59 = vmul.f32 %v2548_v17, %v2680_v40  ;;  %v1471_v14 = vmul.f32 %v2562_v23, %v2943_v53  ;;  %1974 = vmatmul.f32.vlgmr.msra.gmra.mxu1 %v1890_v52 }
  0x52   : > { %v1111_v34 = vadd.f32 %v1026_v22, %v870_v4  ;;  %v4681_v47 = vrot.slane %v2687_v44, 1  ;;  %v1286_v2 = vrot.slane %v1165_v29, 2  ;;  %v1712_v12 = vmul.f32 %v2574_v28, %v2943_v53 }
  0x53   : > { %v498_v51 = vsel %vm433_vm0, %v4679_v42, %v497_v41  ;;  %v740_v60 = vsel %vm675_vm1, %v4680_v13, %v739_v19  ;;  %v1592_v31 = vrot.slane %v1471_v14, 1  ;;  %v273_v49 = vmul.f32 %v2529_v8, %v2730_v39 }
  0x54   : > { %v571_v3 = vadd.f32 %v498_v51, %v297_v48  ;;  %v1046_v27 = vsel %vm433_vm0, %v4681_v47, %v1045_v21  ;;  %v339_v25 = vmul.f32 %v2531_v9, %v216_v0  ;;  %v1352_v33 = vadd.f32 %v1267_v26, %v1111_v34  ;;  %v2989_v26 = vld [vmem:[%s2524_s5 + $0x40] sm:$0x3] }
  0x55   : > { %v4682_v48 = vrot.slane %v2701_v55, 2  ;;  %v581_v38 = vmul.f32 %v2533_v10, %v216_v0  ;;  %v4683_v56 = vrot.slane %v2712_v63, 1  ;;  %v1833_v19 = vrot.slane %v1712_v12, 2 }
  0x56   : > { %v813_v22 = vadd.f32 %v740_v60, %v571_v3  ;;  %v437_v52 = vrot.slane %v339_v25, 1  ;;  %v822_v4 = vmul.f32 %v2535_v11, %v2748_v62  ;;  %v1417_v39 = vadd.f32 %v1385_v30, %v1352_v33 }
  0x57   : > { %v1287_v44 = vsel %vm675_vm1, %v4682_v48, %v1286_v2  ;;  %v1593_v41 = vsel %vm433_vm0, %v4683_v56, %v1592_v31  ;;  %v679_v29 = vrot.slane %v581_v38, 2  ;;  %v888_v55 = vmul.f32 %v2544_v15, %v2974_v61  ;;  %v228_v31 = vld [vmem:[%s2524_s5 + $0x70] sm:$0x3] }
  0x58   : > { %v878_v21 = vadd.f32 %v846_v24, %v813_v22  ;;  %v4684_v0 = vrot.slane %v2727_v37, 2  ;;  %v4685_v42 = vrot.slane %v2752_v43, 1  ;;  %v1129_v30 = vmul.f32 %v2546_v16, %v2974_v61 }
  0x59   : > { %v1369_v24 = vmul.f32 %v2548_v17, %v2772_v20  ;;  %v1658_v13 = vadd.f32 %v1573_v18, %v1417_v39  ;;  %v4686_v34 = vrot.slane %v2757_v1, 2  ;;  %v985_v3 = vrot.slane %v888_v55, 1  ;;  %v3012_v18 = vld [vmem:[%s2524_s5 + $0x88] sm:$0x3] }
  0x5a   : > { %v1834_v63 = vsel %vm675_vm1, %v4684_v0, %v1833_v19  ;;  %v438_v51 = vsel %vm433_vm0, %v4685_v42, %v437_v52  ;;  %v1119_v60 = vadd.f32 %v1046_v27, %v878_v21  ;;  %v1226_v47 = vrot.slane %v1129_v30, 2 }
  0x5b   : > { %v547_v14 = vadd.f32 %v438_v51, %v273_v49  ;;  %v680_v37 = vsel %vm675_vm1, %v4686_v34, %v679_v29  ;;  %v1435_v43 = vmul.f32 %v2562_v23, %v2989_v26  ;;  %v1676_v2 = vmul.f32 %v2574_v28, %v2989_v26 }
  0x5c   : > { %v1899_v12 = vadd.f32 %v1814_v54, %v1658_v13  ;;  %v1360_v25 = vadd.f32 %v1287_v44, %v1119_v60  ;;  %v281_v1 = vmul.f32 %v2529_v8, %v2807_v50  ;;  %v4687_v27 = vrot.slane %v2776_v58, 1  ;;  %v3023_v44 = vld [vmem:[%s2524_s5 + $0xa0] sm:$0x3] }
  0x5d   : > { %v789_v33 = vadd.f32 %v680_v37, %v547_v14  ;;  %v4688_v22 = vrot.slane %v2788_v7, 2  ;;  %v1532_v38 = vrot.slane %v1435_v43, 1  ;;  %v1773_v56 = vrot.slane %v1676_v2, 2  ;;  %4689 = vst [vmem:[#allocation21_spill] sm:$0xff] %v3023_v44  ;;  %v4692_v14 = vld [vmem:[#allocation14_spill] sm:$0xff] }
  0x5e   : > { %v986_v49 = vsel %vm433_vm0, %v4687_v27, %v985_v3  ;;  %2001 = vmatmul.f32.gmra.mxu2 %v1899_v12  ;;  %v1425_v19 = vadd.f32 %v1393_v59, %v1360_v25  ;;  %v351_v52 = vmul.f32 %v2531_v9, %v228_v31  ;;  %v593_v39 = vmul.f32 %v2533_v10, %v228_v31 }
  0x5f   : > { %v1227_v48 = vsel %vm675_vm1, %v4688_v22, %v1226_v47  ;;  %v854_v54 = vadd.f32 %v822_v4, %v789_v33  ;;  %v4690_v50 = vrot.slane %v2798_v46, 1  ;;  %v4691_v21 = vrot.slane %v2815_v35, 2  ;;  %v4696_v33 = vld [vmem:[#allocation5_spill] sm:$0xff] }
  0x60   : > { %v830_v29 = vmul.f32 %v2535_v11, %v2827_v5  ;;  %v900_v59 = vmul.f32 %v2544_v15, %v3012_v18  ;;  %v1666_v4 = vadd.f32 %v1593_v41, %v1425_v19  ;;  %v457_v0 = vrot.slane %v351_v52, 1 }
  0x61   : > { %v1533_v58 = vsel %vm433_vm0, %v4690_v50, %v1532_v38  ;;  %v1774_v7 = vsel %vm675_vm1, %v4691_v21, %v1773_v56  ;;  %v1095_v55 = vadd.f32 %v986_v49, %v854_v54  ;;  %v699_v42 = vrot.slane %v593_v39, 2 }
  0x62   : > { %v1005_v51 = vrot.slane %v900_v59, 1  ;;  %v1141_v46 = vmul.f32 %v2546_v16, %v3012_v18  ;;  %v1377_v30 = vmul.f32 %v2548_v17, %v2850_v57  ;;  %v1447_v35 = vmul.f32 %v2562_v23, %v3023_v44 }
  0x63   : > { %v1907_v13 = vadd.f32 %v1834_v63, %v1666_v4  ;;  %v1336_v60 = vadd.f32 %v1227_v48, %v1095_v55  ;;  %v4693_v34 = vrot.slane %v4692_v14, 1  ;;  %v4694_v41 = vrot.slane %v2839_v36, 2  ;;  %v4699_v48 = vld [vmem:[#allocation17_spill] sm:$0xff]  ;;  %v4702_v55 = vld [vmem:[#allocation7_spill] sm:$0xff] }
  0x64   : > { %v4695_v43 = vrot.slane %v2855_v45, 1  ;;  %v1246_v31 = vrot.slane %v1141_v46, 2  ;;  %v1552_v12 = vrot.slane %v1447_v35, 1  ;;  %v1688_v63 = vmul.f32 %v2574_v28, %v3023_v44  ;;  %v3081_v35 = vld [vmem:[%s2524_s5 + $0x108] sm:$0xff] }
  0x65   : > { %v458_v37 = vsel %vm433_vm0, %v4693_v34, %v457_v0  ;;  %v700_v3 = vsel %vm675_vm1, %v4694_v41, %v699_v42  ;;  %2025 = vmatmul.f32.gmra.mxu3 %v1907_v13  ;;  %v1401_v25 = vadd.f32 %v1369_v24, %v1336_v60  ;;  %v290_v27 = vmul.f32 %v2529_v8, %v4696_v33  ;;  %v4701_v24 = vld [vmem:[#allocation6_spill] sm:$0xff]  ;;  %v3094_v41 = vld [vmem:[%s2524_s5 + $0x110] sm:$0xff] }
  0x66   : > { %v555_v47 = vadd.f32 %v458_v37, %v281_v1  ;;  %v1006_v2 = vsel %vm433_vm0, %v4695_v43, %v1005_v51  ;;  %v364_v36 = vmul.f32 %v2531_v9, %v4696_v33  ;;  %v4697_v1 = vld [vmem:[#allocation16_spill] sm:$0xff]  ;;  %v4700_v38 = vrot.slane %v4699_v48, 1  ;;  %v4703_v51 = vld [vmem:[#allocation18_spill] sm:$0xff]  ;;  %4705 = vst [vmem:[#allocation14_spill] sm:$0xff] %v3081_v35 }
  0x67   : > { %v4698_v22 = vrot.slane %v4697_v1, 2  ;;  %v3066_v19 = vmul.f32 %v2531_v9, %v4701_v24  ;;  %v1642_v54 = vadd.f32 %v1533_v58, %v1401_v25  ;;  %v1793_v52 = vrot.slane %v1688_v63, 2  ;;  %v4706_v37 = vld [vmem:[#allocation8_spill] sm:$0xff] }
  0x68   : > { %v797_v49 = vadd.f32 %v700_v3, %v555_v47  ;;  %v1553_v56 = vsel %vm433_vm0, %v4700_v38, %v1552_v12  ;;  %v479_v39 = vrot.slane %v364_v36, 1  ;;  %v606_v50 = vmul.f32 %v2533_v10, %v4696_v33 }
  0x69   : > { %v1247_v45 = vsel %vm675_vm1, %v4698_v22, %v1246_v31  ;;  %v4554_v59 = vrot.slane %v3066_v19, 1  ;;  %v3073_v4 = vmul.f32 %v2533_v10, %v4701_v24  ;;  %v839_v0 = vmul.f32 %v2535_v11, %v4702_v55 }
  0x6a   : > { %v862_v21 = vadd.f32 %v830_v29, %v797_v49  ;;  %v1883_v42 = vadd.f32 %v1774_v7, %v1642_v54  ;;  %v4704_v46 = vrot.slane %v4703_v51, 2  ;;  %v721_v13 = vrot.slane %v606_v50, 2 }
  0x6b   : > { %v913_v29 = vmul.f32 %v2544_v15, %v4702_v55  ;;  %v481_v14 = vsel %vm433_vm0, %v479_v39, %v4554_v59  ;;  %v4553_v34 = vrot.slane %v3073_v4, 2  ;;  %v3091_v7 = vmul.f32 %v2544_v15, %v4706_v37 }
  0x6c   : > { %v1794_v58 = vsel %vm675_vm1, %v4704_v46, %v1793_v52  ;;  %v1103_v60 = vadd.f32 %v1006_v2, %v862_v21  ;;  %1953 = vmatmul.f32.gmra.mxu0 %v1883_v42  ;;  %v564_v3 = vadd.f32 %v481_v14, %v290_v27  ;;  %v1154_v43 = vmul.f32 %v2546_v16, %v4702_v55  ;;  %v4707_v21 = vld [vmem:[#allocation9_spill] sm:$0xff] }
  0x6d   : > { %v1027_v47 = vrot.slane %v913_v29, 1  ;;  %v3100_v2 = vmul.f32 %v2546_v16, %v4706_v37  ;;  %v723_v12 = vsel %vm675_vm1, %v721_v13, %v4553_v34  ;;  %v4552_v25 = vrot.slane %v3091_v7, 1 }
  0x6e   : > { %v1344_v31 = vadd.f32 %v1247_v45, %v1103_v60  ;;  %v1386_v63 = vmul.f32 %v2548_v17, %v3081_v35  ;;  %v806_v33 = vadd.f32 %v723_v12, %v564_v3  ;;  %v1268_v27 = vrot.slane %v1154_v43, 2  ;;  %v4709_v12 = vld [vmem:[#allocation10_spill] sm:$0xff] }
  0x6f   : > { %v4551_v36 = vrot.slane %v3100_v2, 2  ;;  %v1460_v49 = vmul.f32 %v2562_v23, %v3081_v35  ;;  %v1029_v22 = vsel %vm433_vm0, %v1027_v47, %v4552_v25  ;;  %v3116_v45 = vmul.f32 %v2562_v23, %v3094_v41 }
  0x70   : > { %v1409_v1 = vadd.f32 %v1377_v30, %v1344_v31  ;;  %v1701_v48 = vmul.f32 %v2574_v28, %v3081_v35  ;;  %v871_v38 = vadd.f32 %v839_v0, %v806_v33  ;;  %v3125_v30 = vmul.f32 %v2574_v28, %v3094_v41 }
  0x71   : > { %v1270_v24 = vsel %vm675_vm1, %v1268_v27, %v4551_v36  ;;  %v1574_v54 = vrot.slane %v1460_v49, 1  ;;  %v4550_v39 = vrot.slane %v3116_v45, 1  ;;  %v298_v55 = vmul.f32 %v2529_v8, %v4707_v21 }
  0x72   : > { %v1650_v52 = vadd.f32 %v1553_v56, %v1409_v1  ;;  %v1815_v50 = vrot.slane %v1701_v48, 2  ;;  %v1112_v42 = vadd.f32 %v1029_v22, %v871_v38  ;;  %v4549_v0 = vrot.slane %v3125_v30, 2  ;;  %v3159_v1 = vld [vmem:[%s2524_s5 + $0x170] sm:$0xff] }
  0x73   : > { %v376_v51 = vmul.f32 %v2531_v9, %v4707_v21  ;;  %v3135_v46 = vmul.f32 %v2531_v9, %v2657_v6  ;;  %v1576_v56 = vsel %vm433_vm0, %v1574_v54, %v4550_v39  ;;  %v618_v29 = vmul.f32 %v2533_v10, %v4707_v21 }
  0x74   : > { %v1891_v13 = vadd.f32 %v1794_v58, %v1650_v52  ;;  %v3144_v60 = vmul.f32 %v2533_v10, %v2657_v6  ;;  %v1353_v14 = vadd.f32 %v1270_v24, %v1112_v42  ;;  %v1817_v37 = vsel %vm675_vm1, %v1815_v50, %v4549_v0  ;;  %v3151_v58 = vld [vmem:[%s2524_s5 + $0x168] sm:$0xff] }
  0x75   : > { %v499_v3 = vrot.slane %v376_v51, 1  ;;  %v4547_v47 = vrot.slane %v3135_v46, 1  ;;  %4708 = vst [vmem:[#allocation5_spill] sm:$0xff] %v3151_v58  ;;  %v741_v43 = vrot.slane %v618_v29, 2  ;;  %v847_v33 = vmul.f32 %v2535_v11, %v4709_v12 }
  0x76   : > { %1977 = vmatmul.f32.gmra.mxu1 %v1891_v13  ;;  %v4546_v31 = vrot.slane %v3144_v60, 2  ;;  %v925_v27 = vmul.f32 %v2544_v15, %v4709_v12  ;;  %v1418_v49 = vadd.f32 %v1386_v63, %v1353_v14  ;;  %v3166_v48 = vmul.f32 %v2544_v15, %v2680_v40 }
  0x77   : > { %v501_v22 = vsel %vm433_vm0, %v499_v3, %v4547_v47  ;;  %v1166_v38 = vmul.f32 %v2546_v16, %v4709_v12  ;;  %v3175_v63 = vmul.f32 %v2546_v16, %v2680_v40  ;;  %v1394_v51 = vmul.f32 %v2548_v17, %v3151_v58  ;;  %v3230_v47 = vld [vmem:[%s2524_s5 + $0x50] sm:$0xff] }
  0x78   : > { %v572_v24 = vadd.f32 %v501_v22, %v298_v55  ;;  %v743_v54 = vsel %vm675_vm1, %v741_v43, %v4546_v31  ;;  %v1047_v52 = vrot.slane %v925_v27, 1  ;;  %v1659_v50 = vadd.f32 %v1576_v56, %v1418_v49 }
  0x79   : > { %v4543_v21 = vrot.slane %v3166_v48, 1  ;;  %v1288_v42 = vrot.slane %v1166_v38, 2  ;;  %v4545_v29 = vrot.slane %v3175_v63, 2  ;;  %v1472_v55 = vmul.f32 %v2562_v23, %v3151_v58 }
  0x7a   : > { %v814_v13 = vadd.f32 %v743_v54, %v572_v24  ;;  %v3185_v14 = vmul.f32 %v2562_v23, %v3159_v1  ;;  %v1900_v3 = vadd.f32 %v1817_v37, %v1659_v50  ;;  %v1713_v43 = vmul.f32 %v2574_v28, %v3151_v58  ;;  %v4710_v54 = vld [vmem:[#allocation11_spill] sm:$0xff] }
  0x7b   : > { %v1049_v56 = vsel %vm433_vm0, %v1047_v52, %v4543_v21  ;;  %v3194_v12 = vmul.f32 %v2574_v28, %v3159_v1  ;;  %v1290_v49 = vsel %vm675_vm1, %v1288_v42, %v4545_v29  ;;  %v1594_v22 = vrot.slane %v1472_v55, 1 }
  0x7c   : > { %v879_v27 = vadd.f32 %v847_v33, %v814_v13  ;;  %v4544_v37 = vrot.slane %v3185_v14, 1  ;;  %2004 = vmatmul.f32.gmra.mxu2 %v1900_v3  ;;  %v1835_v38 = vrot.slane %v1713_v43, 2  ;;  %v274_v52 = vmul.f32 %v2529_v8, %v4710_v54  ;;  %v3218_v3 = vld [vmem:[%s2524_s5 + $0x48] sm:$0xff] }
  0x7d   : > { %v4548_v24 = vrot.slane %v3194_v12, 2  ;;  %v340_v50 = vmul.f32 %v2531_v9, %v4710_v54  ;;  %v3210_v42 = vmul.f32 %v2531_v9, %v2748_v62  ;;  %v582_v13 = vmul.f32 %v2533_v10, %v4710_v54  ;;  %4711 = vst [vmem:[#allocation16_spill] sm:$0xff] %v3218_v3 }
  0x7e   : > { %v1120_v21 = vadd.f32 %v1049_v56, %v879_v27  ;;  %v1596_v33 = vsel %vm433_vm0, %v1594_v22, %v4544_v37  ;;  %v3222_v56 = vmul.f32 %v2533_v10, %v2748_v62  ;;  %v4712_v27 = vld [vmem:[#allocation12_spill] sm:$0xff]  ;;  %v1370_v39 = vmul.f32 %v2548_v17, %v3218_v3 }
  0x7f   : > { %v1837_v55 = vsel %vm675_vm1, %v1835_v38, %v4548_v24  ;;  %v439_v43 = vrot.slane %v340_v50, 1  ;;  %v823_v22 = vmul.f32 %v2535_v11, %v4712_v27  ;;  %v4561_v29 = vrot.slane %v3210_v42, 1 }
  0x80   : > { %v1361_v37 = vadd.f32 %v1290_v49, %v1120_v21  ;;  %v681_v31 = vrot.slane %v582_v13, 2  ;;  %v889_v54 = vmul.f32 %v2544_v15, %v4712_v27  ;;  %v4558_v38 = vrot.slane %v3222_v56, 2 }
  0x81   : > { %v3235_v50 = vmul.f32 %v2544_v15, %v2772_v20  ;;  %v1130_v24 = vmul.f32 %v2546_v16, %v4712_v27  ;;  %v3241_v21 = vmul.f32 %v2546_v16, %v2772_v20  ;;  %v441_v13 = vsel %vm433_vm0, %v439_v43, %v4561_v29 }
  0x82   : > { %v1426_v49 = vadd.f32 %v1394_v51, %v1361_v37  ;;  %v987_v0 = vrot.slane %v889_v54, 1  ;;  %v548_v36 = vadd.f32 %v441_v13, %v274_v52  ;;  %v683_v25 = vsel %vm675_vm1, %v681_v31, %v4558_v38 }
  0x83   : > { %v4557_v27 = vrot.slane %v3235_v50, 1  ;;  %v1228_v34 = vrot.slane %v1130_v24, 2  ;;  %v4560_v58 = vrot.slane %v3241_v21, 2  ;;  %v1436_v51 = vmul.f32 %v2562_v23, %v3218_v3 }
  0x84   : > { %v1667_v59 = vadd.f32 %v1596_v33, %v1426_v49  ;;  %v3257_v37 = vmul.f32 %v2562_v23, %v3230_v47  ;;  %v790_v43 = vadd.f32 %v683_v25, %v548_v36  ;;  %v1677_v31 = vmul.f32 %v2574_v28, %v3218_v3 }
  0x85   : > { %v989_v52 = vsel %vm433_vm0, %v987_v0, %v4557_v27  ;;  %v3266_v24 = vmul.f32 %v2574_v28, %v3230_v47  ;;  %v1230_v54 = vsel %vm675_vm1, %v1228_v34, %v4560_v58  ;;  %v1534_v49 = vrot.slane %v1436_v51, 1  ;;  %v4715_v27 = vld [vmem:[#allocation13_spill] sm:$0xff] }
  0x86   : > { %4713 = vst [vmem:[#allocation17_spill] sm:$0xff] %v3257_v37  ;;  %v1908_v33 = vadd.f32 %v1837_v55, %v1667_v59  ;;  %v4559_v25 = vrot.slane %v3257_v37, 1  ;;  %v855_v36 = vadd.f32 %v823_v22, %v790_v43  ;;  %v1775_v13 = vrot.slane %v1677_v31, 2  ;;  %v3290_v31 = vld [vmem:[%s2524_s5 + $0xa8] sm:$0xff] }
  0x87   : > { %4714 = vst [vmem:[#allocation6_spill] sm:$0xff] %v3266_v24  ;;  %v4564_v0 = vrot.slane %v3266_v24, 2  ;;  %v282_v38 = vmul.f32 %v2529_v8, %v4715_v27  ;;  %v352_v55 = vmul.f32 %v2531_v9, %v4715_v27  ;;  %v3282_v34 = vmul.f32 %v2531_v9, %v2827_v5 }
  0x88   : > { %2028 = vmatmul.f32.gmra.mxu3 %v1908_v33  ;;  %v1536_v59 = vsel %vm433_vm0, %v1534_v49, %v4559_v25  ;;  %v594_v22 = vmul.f32 %v2533_v10, %v4715_v27  ;;  %v1096_v51 = vadd.f32 %v989_v52, %v855_v36  ;;  %4717 = vst [vmem:[#allocation18_spill] sm:$0xff] %v3290_v31  ;;  %v4719_v49 = vld [vmem:[#allocation15_spill] sm:$0xff] }
  0x89   : > { %4716 = vst [vmem:[#allocation7_spill] sm:$0xff] %v3282_v34  ;;  %v1777_v43 = vsel %vm675_vm1, %v1775_v13, %v4564_v0  ;;  %v3294_v33 = vmul.f32 %v2533_v10, %v2827_v5  ;;  %v831_v25 = vmul.f32 %v2535_v11, %v4719_v49  ;;  %v459_v58 = vrot.slane %v352_v55, 1  ;;  %v3302_v36 = vld [vmem:[%s2524_s5 + $0xb0] sm:$0xff] }
  0x8a   : > { %v4572_v29 = vrot.slane %v3282_v34, 1  ;;  %v701_v3 = vrot.slane %v594_v22, 2  ;;  %v901_v27 = vmul.f32 %v2544_v15, %v4719_v49  ;;  %v1337_v52 = vadd.f32 %v1230_v54, %v1096_v51  ;;  %4720 = vst [vmem:[#allocation9_spill] sm:$0xff] %v3302_v36 }
  0x8b   : > { %4718 = vst [vmem:[#allocation8_spill] sm:$0xff] %v3294_v33  ;;  %v3307_v0 = vmul.f32 %v2544_v15, %v2850_v57  ;;  %v1142_v35 = vmul.f32 %v2546_v16, %v4719_v49  ;;  %v3316_v44 = vmul.f32 %v2546_v16, %v2850_v57  ;;  %v1378_v54 = vmul.f32 %v2548_v17, %v3290_v31 }
  0x8c   : > { %v461_v55 = vsel %vm433_vm0, %v459_v58, %v4572_v29  ;;  %v1007_v22 = vrot.slane %v901_v27, 1  ;;  %v1402_v51 = vadd.f32 %v1370_v39, %v1337_v52  ;;  %v4723_v24 = vrot.slane %v3294_v33, 2 }
  0x8d   : > { %4721 = vst [vmem:[#allocation10_spill] sm:$0xff] %v3307_v0  ;;  %v556_v13 = vadd.f32 %v461_v55, %v282_v38  ;;  %v4574_v49 = vrot.slane %v3307_v0, 1  ;;  %v1248_v34 = vrot.slane %v1142_v35, 2  ;;  %v4575_v58 = vrot.slane %v3316_v44, 2 }
  0x8e   : > { %4722 = vst [vmem:[#allocation11_spill] sm:$0xff] %v3316_v44  ;;  %v703_v37 = vsel %vm675_vm1, %v701_v3, %v4723_v24  ;;  %v1448_v27 = vmul.f32 %v2562_v23, %v3290_v31  ;;  %v3329_v29 = vmul.f32 %v2562_v23, %v3302_v36  ;;  %v1643_v39 = vadd.f32 %v1536_v59, %v1402_v51  ;;  %v2293_v51 = vld [vmem:[%s2524_s5 + $0xe0] sm:$0xff] }
  0x8f   : > { %v798_v38 = vadd.f32 %v703_v37, %v556_v13  ;;  %v1009_v3 = vsel %vm433_vm0, %v1007_v22, %v4574_v49  ;;  %v1689_v24 = vmul.f32 %v2574_v28, %v3290_v31  ;;  %v1250_v35 = vsel %vm675_vm1, %v1248_v34, %v4575_v58  ;;  %v3351_v58 = vld [vmem:[%s2524_s5 + $0x118] sm:$0x3] }
  0x90   : > { %4724 = vst [vmem:[#allocation12_spill] sm:$0xff] %v3329_v29  ;;  %v1554_v52 = vrot.slane %v1448_v27, 1  ;;  %v4579_v55 = vrot.slane %v3329_v29, 1  ;;  %v3342_v33 = vmul.f32 %v2574_v28, %v3302_v36  ;;  %v1884_v37 = vadd.f32 %v1777_v43, %v1643_v39  ;;  %v4726_v27 = vld [vmem:[#allocation19_spill] sm:$0xff]  ;;  %v3358_v43 = vld [vmem:[%s2524_s5 + $0xf8] sm:$0xff] }
  0x91   : > { %v863_v59 = vadd.f32 %v831_v25, %v798_v38  ;;  %v1795_v13 = vrot.slane %v1689_v24, 2  ;;  %v291_v22 = vmul.f32 %v2293_v51, %v2529_v8  ;;  %v366_v31 = vmul.f32 %v2531_v9, %v4726_v27  ;;  %4727 = vst [vmem:[#allocation15_spill] sm:$0xff] %v3358_v43  ;;  %v4728_v38 = vld [vmem:[#allocation20_spill] sm:$0xff] }
  0x92   : > { %4725 = vst [vmem:[#allocation13_spill] sm:$0xff] %v3342_v33  ;;  %v1556_v49 = vsel %vm433_vm0, %v1554_v52, %v4579_v55  ;;  %v4585_v34 = vrot.slane %v3342_v33, 2  ;;  %v608_v44 = vmul.f32 %v2533_v10, %v4726_v27  ;;  %1956 = vmatmul.f32.gmra.mxu0 %v1884_v37  ;;  %v840_v39 = vmul.f32 %v3358_v43, %v2535_v11 }
  0x93   : > { %v1104_v25 = vadd.f32 %v1009_v3, %v863_v59  ;;  %v915_v24 = vmul.f32 %v2544_v15, %v4728_v38  ;;  %v1156_v52 = vmul.f32 %v2546_v16, %v4728_v38  ;;  %v482_v55 = vrot.slane %v366_v31, 1 }
  0x94   : > { %v1797_v51 = vsel %vm675_vm1, %v1795_v13, %v4585_v34  ;;  %v724_v29 = vrot.slane %v608_v44, 2  ;;  %v1387_v3 = vmul.f32 %v2548_v17, %v3094_v41  ;;  %v1462_v43 = vmul.f32 %v2562_v23, %v3351_v58 }
  0x95   : > { %v1345_v37 = vadd.f32 %v1250_v35, %v1104_v25  ;;  %v1030_v59 = vrot.slane %v915_v24, 1  ;;  %v1271_v27 = vrot.slane %v1156_v52, 2  ;;  %v4729_v0 = vrot.slane %v3066_v19, 1 }
  0x96   : > { %v4730_v33 = vrot.slane %v3073_v4, 2  ;;  %v1703_v44 = vmul.f32 %v2574_v28, %v3351_v58  ;;  %v299_v31 = vmul.f32 %v2529_v8, %v2657_v6  ;;  %v4731_v24 = vrot.slane %v3091_v7, 1 }
  0x97   : > { %v483_v38 = vsel %vm433_vm0, %v4729_v0, %v482_v55  ;;  %v1410_v35 = vadd.f32 %v1378_v54, %v1345_v37  ;;  %v4732_v19 = vrot.slane %v3100_v2, 2  ;;  %v1577_v55 = vrot.slane %v1462_v43, 1  ;;  %v3394_v54 = vld [vmem:[%s2524_s5 + $0x178] sm:$0x3] }
  0x98   : > { %v725_v13 = vsel %vm675_vm1, %v4730_v33, %v724_v29  ;;  %v565_v25 = vadd.f32 %v483_v38, %v291_v22  ;;  %v1031_v52 = vsel %vm433_vm0, %v4731_v24, %v1030_v59  ;;  %v1818_v4 = vrot.slane %v1703_v44, 2 }
  0x99   : > { %v1272_v0 = vsel %vm675_vm1, %v4732_v19, %v1271_v27  ;;  %v378_v29 = vmul.f32 %v2531_v9, %v2930_v32  ;;  %v620_v33 = vmul.f32 %v2533_v10, %v2930_v32  ;;  %v1651_v34 = vadd.f32 %v1556_v49, %v1410_v35 }
  0x9a   : > { %v807_v6 = vadd.f32 %v725_v13, %v565_v25  ;;  %v848_v7 = vmul.f32 %v2535_v11, %v2680_v40  ;;  %v927_v2 = vmul.f32 %v2544_v15, %v2943_v53  ;;  %v4733_v22 = vrot.slane %v3116_v45, 1 }
  0x9b   : > { %v4734_v37 = vrot.slane %v3125_v30, 2  ;;  %v502_v27 = vrot.slane %v378_v29, 1  ;;  %v744_v32 = vrot.slane %v620_v33, 2  ;;  %v1892_v49 = vadd.f32 %v1797_v51, %v1651_v34 }
  0x9c   : > { %v1578_v43 = vsel %vm433_vm0, %v4733_v22, %v1577_v55  ;;  %v872_v38 = vadd.f32 %v840_v39, %v807_v6  ;;  %v1050_v13 = vrot.slane %v927_v2, 1  ;;  %v1168_v44 = vmul.f32 %v2546_v16, %v2943_v53 }
  0x9d   : > { %v1819_v59 = vsel %vm675_vm1, %v4734_v37, %v1818_v4  ;;  %v4735_v40 = vrot.slane %v3135_v46, 1  ;;  %v4736_v45 = vrot.slane %v3144_v60, 2  ;;  %v1395_v30 = vmul.f32 %v2548_v17, %v3159_v1  ;;  %1980 = vmatmul.f32.gmra.mxu1 %v1892_v49 }
  0x9e   : > { %v1474_v24 = vmul.f32 %v2562_v23, %v3394_v54  ;;  %v1113_v34 = vadd.f32 %v1031_v52, %v872_v38  ;;  %v4737_v51 = vrot.slane %v3166_v48, 1  ;;  %v1291_v46 = vrot.slane %v1168_v44, 2 }
  0x9f   : > { %v503_v35 = vsel %vm433_vm0, %v4735_v40, %v502_v27  ;;  %v745_v25 = vsel %vm675_vm1, %v4736_v45, %v744_v32  ;;  %v1715_v60 = vmul.f32 %v2574_v28, %v3394_v54  ;;  %v275_v55 = vmul.f32 %v2529_v8, %v2748_v62 }
  0xa0   : > { %v573_v39 = vadd.f32 %v503_v35, %v299_v31  ;;  %v1051_v53 = vsel %vm433_vm0, %v4737_v51, %v1050_v13  ;;  %v1597_v19 = vrot.slane %v1474_v24, 1  ;;  %v342_v4 = vmul.f32 %v2531_v9, %v2974_v61 }
  0xa1   : > { %v1354_v29 = vadd.f32 %v1272_v0, %v1113_v34  ;;  %v4738_v31 = vrot.slane %v3175_v63, 2  ;;  %v584_v52 = vmul.f32 %v2533_v10, %v2974_v61  ;;  %v4739_v6 = vrot.slane %v3185_v14, 1  ;;  %v3438_v0 = vld [vmem:[%s2524_s5 + $0x58] sm:$0x3] }
  0xa2   : > { %v815_v33 = vadd.f32 %v745_v25, %v573_v39  ;;  %v1838_v22 = vrot.slane %v1715_v60, 2  ;;  %v442_v37 = vrot.slane %v342_v4, 1  ;;  %v824_v62 = vmul.f32 %v2535_v11, %v2772_v20 }
  0xa3   : > { %v1292_v48 = vsel %vm675_vm1, %v4738_v31, %v1291_v46  ;;  %v1598_v2 = vsel %vm433_vm0, %v4739_v6, %v1597_v19  ;;  %v1419_v27 = vadd.f32 %v1387_v3, %v1354_v29  ;;  %v684_v49 = vrot.slane %v584_v52, 2  ;;  %v3468_v29 = vld [vmem:[%s2524_s5 + $0xb8] sm:$0x3]  ;;  %v4750_v6 = vld [vmem:[#allocation21_spill] sm:$0xff] }
  0xa4   : > { %v880_v32 = vadd.f32 %v848_v7, %v815_v33  ;;  %v891_v63 = vmul.f32 %v2544_v15, %v2989_v26  ;;  %v4740_v38 = vrot.slane %v3194_v12, 2  ;;  %v4741_v14 = vrot.slane %v3210_v42, 1  ;;  %4745 = vst [vmem:[#allocation19_spill] sm:$0xff] %v3468_v29 }
  0xa5   : > { %v1132_v44 = vmul.f32 %v2546_v16, %v2989_v26  ;;  %v1371_v20 = vmul.f32 %v2548_v17, %v3230_v47  ;;  %v1660_v3 = vadd.f32 %v1578_v43, %v1419_v27  ;;  %v4742_v35 = vrot.slane %v3222_v56, 2 }
  0xa6   : > { %v1839_v61 = vsel %vm675_vm1, %v4740_v38, %v1838_v22  ;;  %v443_v13 = vsel %vm433_vm0, %v4741_v14, %v442_v37  ;;  %v1121_v7 = vadd.f32 %v1051_v53, %v880_v32  ;;  %v990_v12 = vrot.slane %v891_v63, 1 }
  0xa7   : > { %v549_v40 = vadd.f32 %v443_v13, %v275_v55  ;;  %v685_v45 = vsel %vm675_vm1, %v4742_v35, %v684_v49  ;;  %v1231_v25 = vrot.slane %v1132_v44, 2  ;;  %v1438_v42 = vmul.f32 %v2562_v23, %v3438_v0  ;;  %v4751_v13 = vld [vmem:[#allocation7_spill] sm:$0xff] }
  0xa8   : > { %v1679_v24 = vmul.f32 %v2574_v28, %v3438_v0  ;;  %v1901_v26 = vadd.f32 %v1819_v59, %v1660_v3  ;;  %v1362_v34 = vadd.f32 %v1292_v48, %v1121_v7  ;;  %v283_v43 = vmul.f32 %v2529_v8, %v2827_v5  ;;  %v4753_v3 = vld [vmem:[#allocation8_spill] sm:$0xff] }
  0xa9   : > { %v791_v39 = vadd.f32 %v685_v45, %v549_v40  ;;  %v4743_v51 = vrot.slane %v3235_v50, 1  ;;  %v4744_v53 = vrot.slane %v3241_v21, 2  ;;  %v1537_v19 = vrot.slane %v1438_v42, 1  ;;  %v4746_v50 = vld [vmem:[#allocation17_spill] sm:$0xff]  ;;  %v4748_v21 = vld [vmem:[#allocation6_spill] sm:$0xff] }
  0xaa   : > { %v1778_v60 = vrot.slane %v1679_v24, 2  ;;  %2007 = vmatmul.f32.gmra.mxu2 %v1901_v26  ;;  %v1427_v55 = vadd.f32 %v1395_v30, %v1362_v34  ;;  %v354_v59 = vmul.f32 %v2531_v9, %v3012_v18  ;;  %v596_v5 = vmul.f32 %v2533_v10, %v3012_v18  ;;  %v4755_v45 = vld [vmem:[#allocation10_spill] sm:$0xff]  ;;  %v2295_v34 = vld [vmem:[%s2524_s5 + $0xf0] sm:$0xff] }
  0xab   : > { %v991_v56 = vsel %vm433_vm0, %v4743_v51, %v990_v12  ;;  %v1232_v46 = vsel %vm675_vm1, %v4744_v53, %v1231_v25  ;;  %v856_v4 = vadd.f32 %v824_v62, %v791_v39  ;;  %v4747_v33 = vrot.slane %v4746_v50, 1  ;;  %v4757_v53 = vld [vmem:[#allocation11_spill] sm:$0xff] }
  0xac   : > { %v4749_v48 = vrot.slane %v4748_v21, 2  ;;  %v832_v30 = vmul.f32 %v2535_v11, %v2850_v57  ;;  %v903_v22 = vmul.f32 %v2544_v15, %v4750_v6  ;;  %v1668_v37 = vadd.f32 %v1598_v2, %v1427_v55 }
  0xad   : > { %v1538_v31 = vsel %vm433_vm0, %v4747_v33, %v1537_v19  ;;  %v1097_v62 = vadd.f32 %v991_v56, %v856_v4  ;;  %v462_v27 = vrot.slane %v354_v59, 1  ;;  %v704_v32 = vrot.slane %v596_v5, 2  ;;  %v4759_v19 = vld [vmem:[#allocation12_spill] sm:$0xff]  ;;  %v4761_v4 = vld [vmem:[#allocation15_spill] sm:$0xff] }
  0xae   : > { %v1779_v52 = vsel %vm675_vm1, %v4749_v48, %v1778_v60  ;;  %v1010_v18 = vrot.slane %v903_v22, 1  ;;  %v1144_v49 = vmul.f32 %v2546_v16, %v4750_v6  ;;  %v1379_v63 = vmul.f32 %v2548_v17, %v3302_v36  ;;  %v4762_v22 = vld [vmem:[#allocation14_spill] sm:$0xff] }
  0xaf   : > { %v1450_v38 = vmul.f32 %v2562_v23, %v3468_v29  ;;  %v1909_v14 = vadd.f32 %v1839_v61, %v1668_v37  ;;  %v1338_v57 = vadd.f32 %v1232_v46, %v1097_v62  ;;  %v4752_v44 = vrot.slane %v4751_v13, 1 }
  0xb0   : > { %v4754_v7 = vrot.slane %v4753_v3, 2  ;;  %v4756_v12 = vrot.slane %v4755_v45, 1  ;;  %v1251_v42 = vrot.slane %v1144_v49, 2  ;;  %v1691_v61 = vmul.f32 %v2574_v28, %v3468_v29 }
  0xb1   : > { %v463_v2 = vsel %vm433_vm0, %v4752_v44, %v462_v27  ;;  %v1557_v24 = vrot.slane %v1450_v38, 1  ;;  %2031 = vmatmul.f32.gmra.mxu3 %v1909_v14  ;;  %v1403_v26 = vadd.f32 %v1371_v20, %v1338_v57  ;;  %v292_v39 = vmul.f32 %v2295_v34, %v2529_v8  ;;  %v4763_v27 = vld [vmem:[#allocation13_spill] sm:$0xff] }
  0xb2   : > { %v705_v40 = vsel %vm675_vm1, %v4754_v7, %v704_v32  ;;  %v557_v35 = vadd.f32 %v463_v2, %v283_v43  ;;  %v1011_v25 = vsel %vm433_vm0, %v4756_v12, %v1010_v18  ;;  %v367_v51 = vmul.f32 %v2295_v34, %v2531_v9 }
  0xb3   : > { %v4758_v46 = vrot.slane %v4757_v53, 2  ;;  %v4760_v60 = vrot.slane %v4759_v19, 1  ;;  %v3512_v20 = vmul.f32 %v4761_v4, %v2531_v9  ;;  %v1644_v59 = vadd.f32 %v1538_v31, %v1403_v26 }
  0xb4   : > { %v799_v56 = vadd.f32 %v705_v40, %v557_v35  ;;  %v1798_v5 = vrot.slane %v1691_v61, 2  ;;  %v484_v50 = vrot.slane %v367_v51, 1  ;;  %v609_v33 = vmul.f32 %v2295_v34, %v2533_v10  ;;  %v3546_v35 = vld [vmem:[%s2524_s5 + $0x120] sm:$0xff]  ;;  %v3557_v34 = vld [vmem:[%s2524_s5 + $0x128] sm:$0xff] }
  0xb5   : > { %v1252_v43 = vsel %vm675_vm1, %v4758_v46, %v1251_v42  ;;  %v1558_v55 = vsel %vm433_vm0, %v4760_v60, %v1557_v24  ;;  %v4600_v48 = vrot.slane %v3512_v20, 1  ;;  %v3518_v6 = vmul.f32 %v4761_v4, %v2533_v10  ;;  %4765 = vst [vmem:[#allocation20_spill] sm:$0xff] %v3546_v35 }
  0xb6   : > { %v864_v21 = vadd.f32 %v832_v30, %v799_v56  ;;  %v841_v37 = vmul.f32 %v2535_v11, %v4762_v22  ;;  %v1885_v62 = vadd.f32 %v1779_v52, %v1644_v59  ;;  %v4764_v32 = vrot.slane %v4763_v27, 2  ;;  %4766 = vst [vmem:[#allocation17_spill] sm:$0xff] %v3557_v34  ;;  %v2298_v59 = vld [vmem:[%s2524_s5 + $0x150] sm:$0xff] }
  0xb7   : > { %v726_v18 = vrot.slane %v609_v33, 2  ;;  %v916_v49 = vmul.f32 %v2544_v15, %v4762_v22  ;;  %v486_v38 = vsel %vm433_vm0, %v484_v50, %v4600_v48  ;;  %v4598_v14 = vrot.slane %v3518_v6, 2 }
  0xb8   : > { %v1799_v31 = vsel %vm675_vm1, %v4764_v32, %v1798_v5  ;;  %v1105_v30 = vadd.f32 %v1011_v25, %v864_v21  ;;  %v3533_v57 = vmul.f32 %v2544_v15, %v3094_v41  ;;  %1959 = vmatmul.f32.gmra.mxu0 %v1885_v62  ;;  %v566_v52 = vadd.f32 %v486_v38, %v292_v39 }
  0xb9   : > { %v1032_v13 = vrot.slane %v916_v49, 1  ;;  %v1157_v44 = vmul.f32 %v2546_v16, %v4762_v22  ;;  %v3539_v2 = vmul.f32 %v2546_v16, %v3094_v41  ;;  %v728_v7 = vsel %vm675_vm1, %v726_v18, %v4598_v14  ;;  %v3578_v22 = vld [vmem:[%s2524_s5 + $0x158] sm:$0xff] }
  0xba   : > { %v1346_v3 = vadd.f32 %v1252_v43, %v1105_v30  ;;  %v4595_v40 = vrot.slane %v3533_v57, 1  ;;  %v1388_v45 = vmul.f32 %v3546_v35, %v2548_v17  ;;  %v808_v12 = vadd.f32 %v728_v7, %v566_v52 }
  0xbb   : > { %v1273_v25 = vrot.slane %v1157_v44, 2  ;;  %v4594_v42 = vrot.slane %v3539_v2, 2  ;;  %v1463_v24 = vmul.f32 %v3546_v35, %v2562_v23  ;;  %v3561_v39 = vmul.f32 %v3557_v34, %v2562_v23  ;;  %v4768_v44 = vld [vmem:[#allocation5_spill] sm:$0xff] }
  0xbc   : > { %v1411_v26 = vadd.f32 %v1379_v63, %v1346_v3  ;;  %v1034_v61 = vsel %vm433_vm0, %v1032_v13, %v4595_v40  ;;  %v1704_v51 = vmul.f32 %v3546_v35, %v2574_v28  ;;  %v873_v56 = vadd.f32 %v841_v37, %v808_v12 }
  0xbd   : > { %v1275_v53 = vsel %vm675_vm1, %v1273_v25, %v4594_v42  ;;  %v1579_v63 = vrot.slane %v1463_v24, 1  ;;  %v3570_v46 = vmul.f32 %v3557_v34, %v2574_v28  ;;  %v4593_v19 = vrot.slane %v3561_v39, 1  ;;  %v3605_v25 = vld [vmem:[%s2524_s5 + $0x188] sm:$0xff] }
  0xbe   : > { %v1652_v43 = vadd.f32 %v1558_v55, %v1411_v26  ;;  %v1820_v60 = vrot.slane %v1704_v51, 2  ;;  %v300_v5 = vmul.f32 %v2298_v59, %v2529_v8  ;;  %v1114_v50 = vadd.f32 %v1034_v61, %v873_v56 }
  0xbf   : > { %v4592_v33 = vrot.slane %v3570_v46, 2  ;;  %v379_v21 = vmul.f32 %v2298_v59, %v2531_v9  ;;  %v3582_v37 = vmul.f32 %v3578_v22, %v2531_v9  ;;  %v1581_v62 = vsel %vm433_vm0, %v1579_v63, %v4593_v19 }
  0xc0   : > { %v1893_v55 = vadd.f32 %v1799_v31, %v1652_v43  ;;  %v621_v27 = vmul.f32 %v2298_v59, %v2533_v10  ;;  %v3590_v32 = vmul.f32 %v3578_v22, %v2533_v10  ;;  %v1355_v18 = vadd.f32 %v1275_v53, %v1114_v50  ;;  %v3597_v31 = vld [vmem:[%s2524_s5 + $0x180] sm:$0xff] }
  0xc1   : > { %v1822_v49 = vsel %vm675_vm1, %v1820_v60, %v4592_v33  ;;  %v504_v30 = vrot.slane %v379_v21, 1  ;;  %v4591_v38 = vrot.slane %v3582_v37, 1  ;;  %4767 = vst [vmem:[#allocation6_spill] sm:$0xff] %v3597_v31  ;;  %v849_v3 = vmul.f32 %v2535_v11, %v4768_v44 }
  0xc2   : > { %1983 = vmatmul.f32.gmra.mxu1 %v1893_v55  ;;  %v746_v52 = vrot.slane %v621_v27, 2  ;;  %v4590_v13 = vrot.slane %v3590_v32, 2  ;;  %v928_v7 = vmul.f32 %v2544_v15, %v4768_v44  ;;  %v1420_v12 = vadd.f32 %v1388_v45, %v1355_v18 }
  0xc3   : > { %v506_v24 = vsel %vm433_vm0, %v504_v30, %v4591_v38  ;;  %v3612_v26 = vmul.f32 %v2544_v15, %v3159_v1  ;;  %v1169_v61 = vmul.f32 %v2546_v16, %v4768_v44  ;;  %v3621_v45 = vmul.f32 %v2546_v16, %v3159_v1 }
  0xc4   : > { %v574_v51 = vadd.f32 %v506_v24, %v300_v5  ;;  %v748_v56 = vsel %vm675_vm1, %v746_v52, %v4590_v13  ;;  %v1052_v53 = vrot.slane %v928_v7, 1  ;;  %v1661_v63 = vadd.f32 %v1581_v62, %v1420_v12  ;;  %v3688_v13 = vld [vmem:[%s2524_s5 + $0x60] sm:$0xff] }
  0xc5   : > { %v4588_v43 = vrot.slane %v3612_v26, 1  ;;  %v1293_v60 = vrot.slane %v1169_v61, 2  ;;  %v1396_v59 = vmul.f32 %v2548_v17, %v3597_v31  ;;  %v4587_v5 = vrot.slane %v3621_v45, 2  ;;  %v2300_v61 = vld [vmem:[%s2524_s5 + $0x30] sm:$0xff]  ;;  %4770 = vst [vmem:[#allocation21_spill] sm:$0xff] %v3688_v13 }
  0xc6   : > { %v816_v50 = vadd.f32 %v748_v56, %v574_v51  ;;  %v1475_v21 = vmul.f32 %v2562_v23, %v3597_v31  ;;  %v3631_v55 = vmul.f32 %v2562_v23, %v3605_v25  ;;  %v1902_v27 = vadd.f32 %v1822_v49, %v1661_v63  ;;  %v3654_v63 = vld [vmem:[%s2524_s5 + $0x38] sm:$0xff] }
  0xc7   : > { %v1054_v62 = vsel %vm433_vm0, %v1052_v53, %v4588_v43  ;;  %v1716_v18 = vmul.f32 %v2574_v28, %v3597_v31  ;;  %v3640_v30 = vmul.f32 %v2574_v28, %v3605_v25  ;;  %v1295_v44 = vsel %vm675_vm1, %v1293_v60, %v4587_v5 }
  0xc8   : > { %v881_v52 = vadd.f32 %v849_v3, %v816_v50  ;;  %v1599_v7 = vrot.slane %v1475_v21, 1  ;;  %v4586_v49 = vrot.slane %v3631_v55, 1  ;;  %2010 = vmatmul.f32.gmra.mxu2 %v1902_v27  ;;  %v276_v51 = vmul.f32 %v2300_v61, %v2529_v8 }
  0xc9   : > { %v1840_v12 = vrot.slane %v1716_v18, 2  ;;  %v4589_v24 = vrot.slane %v3640_v30, 2  ;;  %v343_v56 = vmul.f32 %v2300_v61, %v2531_v9  ;;  %v3658_v60 = vmul.f32 %v3654_v63, %v2531_v9  ;;  %v4769_v18 = vld [vmem:[#allocation16_spill] sm:$0xff] }
  0xca   : > { %v1122_v53 = vadd.f32 %v1054_v62, %v881_v52  ;;  %v1601_v3 = vsel %vm433_vm0, %v1599_v7, %v4586_v49  ;;  %v585_v50 = vmul.f32 %v2300_v61, %v2533_v10  ;;  %v3666_v62 = vmul.f32 %v3654_v63, %v2533_v10 }
  0xcb   : > { %v1842_v21 = vsel %vm675_vm1, %v1840_v12, %v4589_v24  ;;  %v444_v27 = vrot.slane %v343_v56, 1  ;;  %v825_v52 = vmul.f32 %v2535_v11, %v4769_v18  ;;  %v4597_v49 = vrot.slane %v3658_v60, 1 }
  0xcc   : > { %v1363_v7 = vadd.f32 %v1295_v44, %v1122_v53  ;;  %v686_v5 = vrot.slane %v585_v50, 2  ;;  %v892_v61 = vmul.f32 %v2544_v15, %v4769_v18  ;;  %v4596_v43 = vrot.slane %v3666_v62, 2 }
  0xcd   : > { %v3676_v12 = vmul.f32 %v2544_v15, %v3230_v47  ;;  %v1133_v56 = vmul.f32 %v2546_v16, %v4769_v18  ;;  %v3682_v24 = vmul.f32 %v2546_v16, %v3230_v47  ;;  %v446_v53 = vsel %vm433_vm0, %v444_v27, %v4597_v49 }
  0xce   : > { %v1428_v44 = vadd.f32 %v1396_v59, %v1363_v7  ;;  %v992_v50 = vrot.slane %v892_v61, 1  ;;  %v1372_v38 = vmul.f32 %v3688_v13, %v2548_v17  ;;  %v550_v33 = vadd.f32 %v446_v53, %v276_v51  ;;  %v3700_v7 = vld [vmem:[%s2524_s5 + $0x68] sm:$0xff] }
  0xcf   : > { %v688_v18 = vsel %vm675_vm1, %v686_v5, %v4596_v43  ;;  %v4599_v19 = vrot.slane %v3676_v12, 1  ;;  %v1233_v42 = vrot.slane %v1133_v56, 2  ;;  %v4602_v59 = vrot.slane %v3682_v24, 2 }
  0xd0   : > { %v1669_v40 = vadd.f32 %v1601_v3, %v1428_v44  ;;  %v1439_v27 = vmul.f32 %v3688_v13, %v2562_v23  ;;  %v3704_v61 = vmul.f32 %v3700_v7, %v2562_v23  ;;  %v792_v51 = vadd.f32 %v688_v18, %v550_v33 }
  0xd1   : > { %v994_v5 = vsel %vm433_vm0, %v992_v50, %v4599_v19  ;;  %v1680_v3 = vmul.f32 %v3688_v13, %v2574_v28  ;;  %v3713_v56 = vmul.f32 %v3700_v7, %v2574_v28  ;;  %v1235_v53 = vsel %vm675_vm1, %v1233_v42, %v4602_v59  ;;  %v2304_v50 = vld [vmem:[%s2524_s5 + $0x90] sm:$0xff] }
  0xd2   : > { %v1910_v44 = vadd.f32 %v1842_v21, %v1669_v40  ;;  %v1539_v43 = vrot.slane %v1439_v27, 1  ;;  %v4601_v33 = vrot.slane %v3704_v61, 1  ;;  %v857_v18 = vadd.f32 %v825_v52, %v792_v51  ;;  %v3727_v21 = vld [vmem:[%s2524_s5 + $0x98] sm:$0xff] }
  0xd3   : > { %4771 = vst [vmem:[#allocation7_spill] sm:$0xff] %v3713_v56  ;;  %v1780_v49 = vrot.slane %v1680_v3, 2  ;;  %v4607_v14 = vrot.slane %v3713_v56, 2  ;;  %v284_v19 = vmul.f32 %v2304_v50, %v2529_v8  ;;  %v355_v40 = vmul.f32 %v2304_v50, %v2531_v9 }
  0xd4   : > { %2034 = vmatmul.f32.gmra.mxu3 %v1910_v44  ;;  %v1541_v48 = vsel %vm433_vm0, %v1539_v43, %v4601_v33  ;;  %v3731_v42 = vmul.f32 %v3727_v21, %v2531_v9  ;;  %v597_v52 = vmul.f32 %v2304_v50, %v2533_v10  ;;  %v1098_v27 = vadd.f32 %v994_v5, %v857_v18  ;;  %v4774_v43 = vld [vmem:[#allocation18_spill] sm:$0xff] }
  0xd5   : > { %v1782_v51 = vsel %vm675_vm1, %v1780_v49, %v4607_v14  ;;  %v3739_v3 = vmul.f32 %v3727_v21, %v2533_v10  ;;  %v833_v44 = vmul.f32 %v2535_v11, %v4774_v43  ;;  %v464_v33 = vrot.slane %v355_v40, 1 }
  0xd6   : > { %4772 = vst [vmem:[#allocation8_spill] sm:$0xff] %v3731_v42  ;;  %v4614_v59 = vrot.slane %v3731_v42, 1  ;;  %v706_v13 = vrot.slane %v597_v52, 2  ;;  %v904_v50 = vmul.f32 %v2544_v15, %v4774_v43  ;;  %v1339_v31 = vadd.f32 %v1235_v53, %v1098_v27  ;;  %v3761_v53 = vld [vmem:[%s2524_s5 + $0xc0] sm:$0xff] }
  0xd7   : > { %4773 = vst [vmem:[#allocation10_spill] sm:$0xff] %v3739_v3  ;;  %v3749_v49 = vmul.f32 %v2544_v15, %v3302_v36  ;;  %v1145_v18 = vmul.f32 %v2546_v16, %v4774_v43  ;;  %v3758_v52 = vmul.f32 %v2546_v16, %v3302_v36  ;;  %v1380_v27 = vmul.f32 %v3761_v53, %v2548_v17 }
  0xd8   : > { %v466_v40 = vsel %vm433_vm0, %v464_v33, %v4614_v59  ;;  %v1012_v14 = vrot.slane %v904_v50, 1  ;;  %4775 = vst [vmem:[#allocation11_spill] sm:$0xff] %v3761_v53  ;;  %v1404_v5 = vadd.f32 %v1372_v38, %v1339_v31  ;;  %v4776_v29 = vrot.slane %v3739_v3, 2  ;;  %v3773_v59 = vld [vmem:[%s2524_s5 + $0xc8] sm:$0xff] }
  0xd9   : > { %v558_v35 = vadd.f32 %v466_v40, %v284_v19  ;;  %v4617_v42 = vrot.slane %v3749_v49, 1  ;;  %v1253_v56 = vrot.slane %v1145_v18, 2  ;;  %v4618_v33 = vrot.slane %v3758_v52, 2  ;;  %4777 = vst [vmem:[#allocation12_spill] sm:$0xff] %v3773_v59 }
  0xda   : > { %v708_v43 = vsel %vm675_vm1, %v706_v13, %v4776_v29  ;;  %v1451_v50 = vmul.f32 %v3761_v53, %v2562_v23  ;;  %v3777_v36 = vmul.f32 %v3773_v59, %v2562_v23  ;;  %v1645_v19 = vadd.f32 %v1541_v48, %v1404_v5 }
  0xdb   : > { %v800_v38 = vadd.f32 %v708_v43, %v558_v35  ;;  %v1014_v29 = vsel %vm433_vm0, %v1012_v14, %v4617_v42  ;;  %v1692_v31 = vmul.f32 %v3761_v53, %v2574_v28  ;;  %v1255_v13 = vsel %vm675_vm1, %v1253_v56, %v4618_v33  ;;  %v2308_v56 = vld [vmem:[%s2524_s5 + $0x100] sm:$0x3] }
  0xdc   : > { %v1559_v18 = vrot.slane %v1451_v50, 1  ;;  %v4621_v40 = vrot.slane %v3777_v36, 1  ;;  %v3790_v3 = vmul.f32 %v3773_v59, %v2574_v28  ;;  %v1886_v48 = vadd.f32 %v1782_v51, %v1645_v19 }
  0xdd   : > { %v865_v35 = vadd.f32 %v833_v44, %v800_v38  ;;  %v1800_v5 = vrot.slane %v1692_v31, 2  ;;  %v293_v14 = vmul.f32 %v4761_v4, %v2529_v8  ;;  %v369_v50 = vmul.f32 %v2308_v56, %v2531_v9 }
  0xde   : > { %4778 = vst [vmem:[#allocation15_spill] sm:$0xff] %v3790_v3  ;;  %v1561_v43 = vsel %vm433_vm0, %v1559_v18, %v4621_v40  ;;  %v4622_v42 = vrot.slane %v3790_v3, 2  ;;  %v611_v33 = vmul.f32 %v2308_v56, %v2533_v10  ;;  %1962 = vmatmul.f32.gmra.mxu0 %v1886_v48  ;;  %v842_v51 = vmul.f32 %v2535_v11, %v3094_v41  ;;  %v3813_v41 = vld [vmem:[%s2524_s5 + $0x130] sm:$0x3] }
  0xdf   : > { %v1106_v53 = vadd.f32 %v1014_v29, %v865_v35  ;;  %v918_v4 = vmul.f32 %v2544_v15, %v3351_v58  ;;  %v1159_v44 = vmul.f32 %v2546_v16, %v3351_v58  ;;  %v487_v38 = vrot.slane %v369_v50, 1  ;;  %4779 = vst [vmem:[#allocation14_spill] sm:$0xff] %v3813_v41 }
  0xe0   : > { %v1802_v19 = vsel %vm675_vm1, %v1800_v5, %v4622_v42  ;;  %v729_v31 = vrot.slane %v611_v33, 2  ;;  %v1389_v18 = vmul.f32 %v3557_v34, %v2548_v17  ;;  %v1465_v56 = vmul.f32 %v3813_v41, %v2562_v23  ;;  %v2310_v34 = vld [vmem:[%s2524_s5 + $0x160] sm:$0x3] }
  0xe1   : > { %v1347_v29 = vadd.f32 %v1255_v13, %v1106_v53  ;;  %v1035_v48 = vrot.slane %v918_v4, 1  ;;  %v1276_v35 = vrot.slane %v1159_v44, 2  ;;  %v4780_v58 = vrot.slane %v3512_v20, 1 }
  0xe2   : > { %v4781_v5 = vrot.slane %v3518_v6, 2  ;;  %v1706_v50 = vmul.f32 %v3813_v41, %v2574_v28  ;;  %v301_v53 = vmul.f32 %v3578_v22, %v2529_v8  ;;  %v4782_v44 = vrot.slane %v3533_v57, 1  ;;  %v3837_v22 = vld [vmem:[%s2524_s5 + $0x190] sm:$0x3] }
  0xe3   : > { %v488_v40 = vsel %vm433_vm0, %v4780_v58, %v487_v38  ;;  %v1412_v13 = vadd.f32 %v1380_v27, %v1347_v29  ;;  %v4783_v20 = vrot.slane %v3539_v2, 2  ;;  %v1582_v58 = vrot.slane %v1465_v56, 1 }
  0xe4   : > { %v730_v33 = vsel %vm675_vm1, %v4781_v5, %v729_v31  ;;  %v567_v4 = vadd.f32 %v488_v40, %v293_v14  ;;  %v1036_v42 = vsel %vm433_vm0, %v4782_v44, %v1035_v48  ;;  %v1823_v6 = vrot.slane %v1706_v50, 2 }
  0xe5   : > { %v1277_v38 = vsel %vm675_vm1, %v4783_v20, %v1276_v35  ;;  %v381_v31 = vmul.f32 %v2310_v34, %v2531_v9  ;;  %v623_v5 = vmul.f32 %v2310_v34, %v2533_v10  ;;  %v1653_v41 = vadd.f32 %v1561_v43, %v1412_v13  ;;  %v2311_v20 = vld [vmem:[%s2524_s5 + $0x40] sm:$0x3] }
  0xe6   : > { %v809_v3 = vadd.f32 %v730_v33, %v567_v4  ;;  %v850_v57 = vmul.f32 %v2535_v11, %v3159_v1  ;;  %v930_v27 = vmul.f32 %v2544_v15, %v3394_v54  ;;  %v4784_v2 = vrot.slane %v3561_v39, 1 }
  0xe7   : > { %v4785_v14 = vrot.slane %v3570_v46, 2  ;;  %v507_v48 = vrot.slane %v381_v31, 1  ;;  %v749_v34 = vrot.slane %v623_v5, 2  ;;  %v1894_v43 = vadd.f32 %v1802_v19, %v1653_v41 }
  0xe8   : > { %v1583_v40 = vsel %vm433_vm0, %v4784_v2, %v1582_v58  ;;  %v874_v35 = vadd.f32 %v842_v51, %v809_v3  ;;  %v1055_v56 = vrot.slane %v930_v27, 1  ;;  %v1171_v1 = vmul.f32 %v2546_v16, %v3394_v54 }
  0xe9   : > { %v1824_v29 = vsel %vm675_vm1, %v4785_v14, %v1823_v6  ;;  %v4786_v33 = vrot.slane %v3582_v37, 1  ;;  %v4787_v39 = vrot.slane %v3590_v32, 2  ;;  %v1397_v46 = vmul.f32 %v2548_v17, %v3605_v25  ;;  %1986 = vmatmul.f32.gmra.mxu1 %v1894_v43 }
  0xea   : > { %v1477_v19 = vmul.f32 %v2562_v23, %v3837_v22  ;;  %v1115_v3 = vadd.f32 %v1036_v42, %v874_v35  ;;  %v4788_v41 = vrot.slane %v3612_v26, 1  ;;  %v1296_v37 = vrot.slane %v1171_v1, 2 }
  0xeb   : > { %v508_v50 = vsel %vm433_vm0, %v4786_v33, %v507_v48  ;;  %v750_v13 = vsel %vm675_vm1, %v4787_v39, %v749_v34  ;;  %v1718_v32 = vmul.f32 %v2574_v28, %v3837_v22  ;;  %v277_v44 = vmul.f32 %v3654_v63, %v2529_v8 }
  0xec   : > { %v575_v51 = vadd.f32 %v508_v50, %v301_v53  ;;  %v1056_v54 = vsel %vm433_vm0, %v4788_v41, %v1055_v56  ;;  %v1602_v4 = vrot.slane %v1477_v19, 1  ;;  %v345_v58 = vmul.f32 %v2311_v20, %v2531_v9  ;;  %v3895_v19 = vld [vmem:[%s2524_s5 + $0x70] sm:$0x3] }
  0xed   : > { %v1356_v6 = vadd.f32 %v1277_v38, %v1115_v3  ;;  %v4789_v42 = vrot.slane %v3621_v45, 2  ;;  %v587_v26 = vmul.f32 %v2311_v20, %v2533_v10  ;;  %v4790_v5 = vrot.slane %v3631_v55, 1 }
  0xee   : > { %v817_v31 = vadd.f32 %v750_v13, %v575_v51  ;;  %v1843_v2 = vrot.slane %v1718_v32, 2  ;;  %v447_v14 = vrot.slane %v345_v58, 1  ;;  %v826_v63 = vmul.f32 %v2535_v11, %v3230_v47 }
  0xef   : > { %v1297_v53 = vsel %vm675_vm1, %v4789_v42, %v1296_v37  ;;  %v1603_v27 = vsel %vm433_vm0, %v4790_v5, %v1602_v4  ;;  %v1421_v48 = vadd.f32 %v1389_v18, %v1356_v6  ;;  %v689_v38 = vrot.slane %v587_v26, 2  ;;  %v4797_v42 = vld [vmem:[#allocation7_spill] sm:$0xff]  ;;  %v4799_v26 = vld [vmem:[#allocation9_spill] sm:$0xff] }
  0xf0   : > { %v882_v34 = vadd.f32 %v850_v57, %v817_v31  ;;  %v894_v45 = vmul.f32 %v2544_v15, %v3438_v0  ;;  %v4791_v43 = vrot.slane %v3640_v30, 2  ;;  %v4792_v55 = vrot.slane %v3658_v60, 1 }
  0xf1   : > { %v1135_v1 = vmul.f32 %v2546_v16, %v3438_v0  ;;  %v1373_v47 = vmul.f32 %v3700_v7, %v2548_v17  ;;  %v1662_v18 = vadd.f32 %v1583_v40, %v1421_v48  ;;  %v4793_v50 = vrot.slane %v3666_v62, 2 }
  0xf2   : > { %v1844_v35 = vsel %vm675_vm1, %v4791_v43, %v1843_v2  ;;  %v448_v56 = vsel %vm433_vm0, %v4792_v55, %v447_v14  ;;  %v1123_v57 = vadd.f32 %v1056_v54, %v882_v34  ;;  %v995_v30 = vrot.slane %v894_v45, 1  ;;  %v4800_v2 = vld [vmem:[#allocation19_spill] sm:$0xff] }
  0xf3   : > { %v551_v33 = vadd.f32 %v448_v56, %v277_v44  ;;  %v690_v39 = vsel %vm675_vm1, %v4793_v50, %v689_v38  ;;  %v1236_v13 = vrot.slane %v1135_v1, 2  ;;  %v1441_v60 = vmul.f32 %v3895_v19, %v2562_v23  ;;  %v3927_v43 = vld [vmem:[%s2524_s5 + $0xd0] sm:$0x3] }
  0xf4   : > { %v1682_v0 = vmul.f32 %v3895_v19, %v2574_v28  ;;  %v1903_v3 = vadd.f32 %v1824_v29, %v1662_v18  ;;  %v1364_v51 = vadd.f32 %v1297_v53, %v1123_v57  ;;  %v285_v41 = vmul.f32 %v3727_v21, %v2529_v8  ;;  %v2313_v29 = vld [vmem:[%s2524_s5 + $0xa0] sm:$0x3]  ;;  %v4801_v18 = vld [vmem:[#allocation8_spill] sm:$0xff] }
  0xf5   : > { %v793_v40 = vadd.f32 %v690_v39, %v551_v33  ;;  %v4794_v62 = vrot.slane %v3676_v12, 1  ;;  %v4795_v37 = vrot.slane %v3682_v24, 2  ;;  %v1542_v32 = vrot.slane %v1441_v60, 1  ;;  %v4803_v33 = vld [vmem:[#allocation10_spill] sm:$0xff] }
  0xf6   : > { %v1783_v44 = vrot.slane %v1682_v0, 2  ;;  %2013 = vmatmul.f32.gmra.mxu2 %v1903_v3  ;;  %v1429_v20 = vadd.f32 %v1397_v46, %v1364_v51  ;;  %v357_v6 = vmul.f32 %v2313_v29, %v2531_v9  ;;  %v599_v31 = vmul.f32 %v2313_v29, %v2533_v10 }
  0xf7   : > { %v996_v54 = vsel %vm433_vm0, %v4794_v62, %v995_v30  ;;  %v1237_v4 = vsel %vm675_vm1, %v4795_v37, %v1236_v13  ;;  %v858_v58 = vadd.f32 %v826_v63, %v793_v40  ;;  %v4796_v21 = vrot.slane %v3704_v61, 1  ;;  %v2315_v40 = vld [vmem:[%s2524_s5 + $0x108] sm:$0xff] }
  0xf8   : > { %v4798_v53 = vrot.slane %v4797_v42, 2  ;;  %v834_v5 = vmul.f32 %v2535_v11, %v4799_v26  ;;  %v906_v46 = vmul.f32 %v2544_v15, %v4800_v2  ;;  %v1670_v14 = vadd.f32 %v1603_v27, %v1429_v20  ;;  %v4809_v26 = vld [vmem:[#allocation15_spill] sm:$0xff] }
  0xf9   : > { %v1543_v12 = vsel %vm433_vm0, %v4796_v21, %v1542_v32  ;;  %v1099_v63 = vadd.f32 %v996_v54, %v858_v58  ;;  %v467_v48 = vrot.slane %v357_v6, 1  ;;  %v709_v34 = vrot.slane %v599_v31, 2 }
  0xfa   : > { %v1784_v24 = vsel %vm675_vm1, %v4798_v53, %v1783_v44  ;;  %v1015_v38 = vrot.slane %v906_v46, 1  ;;  %v1147_v61 = vmul.f32 %v2546_v16, %v4800_v2  ;;  %v1381_v45 = vmul.f32 %v3773_v59, %v2548_v17  ;;  %v3952_v44 = vld [vmem:[%s2524_s5 + $0x110] sm:$0xff] }
  0xfb   : > { %v1453_v55 = vmul.f32 %v3927_v43, %v2562_v23  ;;  %v1911_v56 = vadd.f32 %v1844_v35, %v1670_v14  ;;  %v1340_v1 = vadd.f32 %v1237_v4, %v1099_v63  ;;  %v4802_v27 = vrot.slane %v4801_v18, 1 }
  0xfc   : > { %v4804_v50 = vrot.slane %v4803_v33, 2  ;;  %v4805_v13 = vrot.slane %v3749_v49, 1  ;;  %v1256_v0 = vrot.slane %v1147_v61, 2  ;;  %v1694_v35 = vmul.f32 %v3927_v43, %v2574_v28 }
  0xfd   : > { %v468_v57 = vsel %vm433_vm0, %v4802_v27, %v467_v48  ;;  %v1562_v3 = vrot.slane %v1453_v55, 1  ;;  %2037 = vmatmul.f32.gmra.mxu3 %v1911_v56  ;;  %v1405_v51 = vadd.f32 %v1373_v47, %v1340_v1  ;;  %v294_v62 = vmul.f32 %v2315_v40, %v2529_v8 }
  0xfe   : > { %v710_v39 = vsel %vm675_vm1, %v4804_v50, %v709_v34  ;;  %v559_v30 = vadd.f32 %v468_v57, %v285_v41  ;;  %v1016_v60 = vsel %vm433_vm0, %v4805_v13, %v1015_v38  ;;  %v370_v54 = vmul.f32 %v2315_v40, %v2531_v9  ;;  %v4811_v34 = vld [vmem:[#allocation17_spill] sm:$0xff]  ;;  %v2317_v57 = vld [vmem:[%s2524_s5 + $0x138] sm:$0xff] }
  0xff   : > { %v4806_v4 = vrot.slane %v3758_v52, 2  ;;  %v4807_v49 = vrot.slane %v3777_v36, 1  ;;  %v3956_v47 = vmul.f32 %v3952_v44, %v2531_v9  ;;  %v1646_v20 = vadd.f32 %v1543_v12, %v1405_v51  ;;  %v4808_v36 = vld [vmem:[#allocation20_spill] sm:$0xff] }
 0x100   : > { %v801_v37 = vadd.f32 %v710_v39, %v559_v30  ;;  %v1803_v58 = vrot.slane %v1694_v35, 2  ;;  %v489_v29 = vrot.slane %v370_v54, 1  ;;  %v612_v6 = vmul.f32 %v2315_v40, %v2533_v10 }
 0x101   : > { %v1257_v41 = vsel %vm675_vm1, %v4806_v4, %v1256_v0  ;;  %v1563_v32 = vsel %vm433_vm0, %v4807_v49, %v1562_v3  ;;  %v4645_v52 = vrot.slane %v3956_v47, 1  ;;  %v3962_v21 = vmul.f32 %v3952_v44, %v2533_v10  ;;  %v3997_v3 = vld [vmem:[%s2524_s5 + $0x140] sm:$0xff]  ;;  %v2319_v49 = vld [vmem:[%s2524_s5 + $0x168] sm:$0xff] }
 0x102   : > { %v866_v31 = vadd.f32 %v834_v5, %v801_v37  ;;  %v843_v42 = vmul.f32 %v4808_v36, %v2535_v11  ;;  %v1887_v53 = vadd.f32 %v1784_v24, %v1646_v20  ;;  %v4810_v2 = vrot.slane %v4809_v26, 2 }
 0x103   : > { %v731_v46 = vrot.slane %v612_v6, 2  ;;  %v919_v14 = vmul.f32 %v4808_v36, %v2544_v15  ;;  %v491_v63 = vsel %vm433_vm0, %v489_v29, %v4645_v52  ;;  %v4644_v48 = vrot.slane %v3962_v21, 2 }
 0x104   : > { %v1804_v12 = vsel %vm675_vm1, %v4810_v2, %v1803_v58  ;;  %v1107_v5 = vadd.f32 %v1016_v60, %v866_v31  ;;  %v3977_v38 = vmul.f32 %v4811_v34, %v2544_v15  ;;  %1965 = vmatmul.f32.gmra.mxu0 %v1887_v53  ;;  %v568_v24 = vadd.f32 %v491_v63, %v294_v62  ;;  %v4017_v31 = vld [vmem:[%s2524_s5 + $0x170] sm:$0xff] }
 0x105   : > { %v1037_v61 = vrot.slane %v919_v14, 1  ;;  %v1160_v55 = vmul.f32 %v4808_v36, %v2546_v16  ;;  %v3983_v56 = vmul.f32 %v4811_v34, %v2546_v16  ;;  %v733_v18 = vsel %vm675_vm1, %v731_v46, %v4644_v48 }
 0x106   : > { %v1348_v1 = vadd.f32 %v1257_v41, %v1107_v5  ;;  %v4641_v27 = vrot.slane %v3977_v38, 1  ;;  %v1390_v33 = vmul.f32 %v2317_v57, %v2548_v17  ;;  %v810_v50 = vadd.f32 %v733_v18, %v568_v24  ;;  %v4812_v24 = vld [vmem:[#allocation6_spill] sm:$0xff]  ;;  %v265_v18 = vld [vmem:[%s2524_s5 + $0x198] sm:$0xff] }
 0x107   : > { %v1278_v39 = vrot.slane %v1160_v55, 2  ;;  %v4638_v30 = vrot.slane %v3983_v56, 2  ;;  %v1466_v13 = vmul.f32 %v2317_v57, %v2562_v23  ;;  %v4001_v51 = vmul.f32 %v3997_v3, %v2562_v23 }
 0x108   : > { %v1413_v60 = vadd.f32 %v1381_v45, %v1348_v1  ;;  %v1039_v0 = vsel %vm433_vm0, %v1037_v61, %v4641_v27  ;;  %v1707_v35 = vmul.f32 %v2317_v57, %v2574_v28  ;;  %v875_v40 = vadd.f32 %v843_v42, %v810_v50  ;;  %v4042_v57 = vld [vmem:[%s2524_s5 + $0x1a0] sm:$0xff]  ;;  %v4817_v27 = vld [vmem:[#allocation11_spill] sm:$0xff] }
 0x109   : > { %v1280_v62 = vsel %vm675_vm1, %v1278_v39, %v4638_v30  ;;  %v1584_v54 = vrot.slane %v1466_v13, 1  ;;  %v4009_v45 = vmul.f32 %v3997_v3, %v2574_v28  ;;  %v4633_v4 = vrot.slane %v4001_v51, 1 }
 0x10a   : > { %v1654_v37 = vadd.f32 %v1563_v32, %v1413_v60  ;;  %v1825_v41 = vrot.slane %v1707_v35, 2  ;;  %v302_v20 = vmul.f32 %v2319_v49, %v2529_v8  ;;  %v1116_v58 = vadd.f32 %v1039_v0, %v875_v40 }
 0x10b   : > { %v4632_v29 = vrot.slane %v4009_v45, 2  ;;  %v382_v6 = vmul.f32 %v2319_v49, %v2531_v9  ;;  %v4021_v36 = vmul.f32 %v4017_v31, %v2531_v9  ;;  %v1586_v42 = vsel %vm433_vm0, %v1584_v54, %v4633_v4 }
 0x10c   : > { %v1895_v32 = vadd.f32 %v1804_v12, %v1654_v37  ;;  %v624_v53 = vmul.f32 %v2319_v49, %v2533_v10  ;;  %v4029_v26 = vmul.f32 %v4017_v31, %v2533_v10  ;;  %v1357_v2 = vadd.f32 %v1280_v62, %v1116_v58 }
 0x10d   : > { %v1827_v46 = vsel %vm675_vm1, %v1825_v41, %v4632_v29  ;;  %v509_v14 = vrot.slane %v382_v6, 1  ;;  %v4637_v5 = vrot.slane %v4021_v36, 1  ;;  %v851_v61 = vmul.f32 %v2535_v11, %v4812_v24 }
 0x10e   : > { %1989 = vmatmul.f32.gmra.mxu1 %v1895_v32  ;;  %v751_v12 = vrot.slane %v624_v53, 2  ;;  %v4634_v63 = vrot.slane %v4029_v26, 2  ;;  %v931_v55 = vmul.f32 %v2544_v15, %v4812_v24  ;;  %v1422_v1 = vadd.f32 %v1390_v33, %v1357_v2 }
 0x10f   : > { %v511_v50 = vsel %vm433_vm0, %v509_v14, %v4637_v5  ;;  %v4049_v39 = vmul.f32 %v2544_v15, %v3605_v25  ;;  %v1172_v13 = vmul.f32 %v2546_v16, %v4812_v24  ;;  %v4058_v35 = vmul.f32 %v2546_v16, %v3605_v25  ;;  %v2325_v5 = vld [vmem:[%s2524_s5 + $0xa8] sm:$0xff] }
 0x110   : > { %v576_v60 = vadd.f32 %v511_v50, %v302_v20  ;;  %v753_v0 = vsel %vm675_vm1, %v751_v12, %v4634_v63  ;;  %v1057_v33 = vrot.slane %v931_v55, 1  ;;  %v1663_v40 = vadd.f32 %v1586_v42, %v1422_v1  ;;  %v2321_v1 = vld [vmem:[%s2524_s5 + $0x48] sm:$0xff] }
 0x111   : > { %v4631_v62 = vrot.slane %v4049_v39, 1  ;;  %v1298_v54 = vrot.slane %v1172_v13, 2  ;;  %v4630_v41 = vrot.slane %v4058_v35, 2  ;;  %v1478_v49 = vmul.f32 %v2562_v23, %v265_v18 }
 0x112   : > { %v818_v37 = vadd.f32 %v753_v0, %v576_v60  ;;  %v4065_v20 = vmul.f32 %v2562_v23, %v4042_v57  ;;  %v1904_v58 = vadd.f32 %v1827_v46, %v1663_v40  ;;  %v1719_v32 = vmul.f32 %v2574_v28, %v265_v18 }
 0x113   : > { %v1059_v6 = vsel %vm433_vm0, %v1057_v33, %v4631_v62  ;;  %v4073_v42 = vmul.f32 %v2574_v28, %v4042_v57  ;;  %v1398_v2 = vmul.f32 %v2548_v17, %v265_v18  ;;  %v1604_v14 = vrot.slane %v1478_v49, 1 }
 0x114   : > { %v883_v53 = vadd.f32 %v851_v61, %v818_v37  ;;  %v4629_v12 = vrot.slane %v4065_v20, 1  ;;  %2016 = vmatmul.f32.gmra.mxu2 %v1904_v58  ;;  %v1300_v46 = vsel %vm675_vm1, %v1298_v54, %v4630_v41  ;;  %v1845_v24 = vrot.slane %v1719_v32, 2  ;;  %v4085_v61 = vld [vmem:[%s2524_s5 + $0x50] sm:$0xff]  ;;  %v4813_v32 = vld [vmem:[#allocation21_spill] sm:$0xff] }
 0x115   : > { %v4628_v55 = vrot.slane %v4073_v42, 2  ;;  %v346_v50 = vmul.f32 %v2321_v1, %v2531_v9  ;;  %v278_v60 = vmul.f32 %v2321_v1, %v2529_v8  ;;  %v4089_v18 = vmul.f32 %v4085_v61, %v2531_v9 }
 0x116   : > { %v1124_v13 = vadd.f32 %v1059_v6, %v883_v53  ;;  %v588_v0 = vmul.f32 %v2321_v1, %v2533_v10  ;;  %v1606_v33 = vsel %vm433_vm0, %v1604_v14, %v4629_v12  ;;  %v4100_v37 = vmul.f32 %v4085_v61, %v2533_v10 }
 0x117   : > { %v1847_v40 = vsel %vm675_vm1, %v1845_v24, %v4628_v55  ;;  %v449_v54 = vrot.slane %v346_v50, 1  ;;  %v4636_v58 = vrot.slane %v4089_v18, 1  ;;  %v895_v53 = vmul.f32 %v4813_v32, %v2544_v15 }
 0x118   : > { %v1365_v49 = vadd.f32 %v1300_v46, %v1124_v13  ;;  %v691_v6 = vrot.slane %v588_v0, 2  ;;  %v4635_v1 = vrot.slane %v4100_v37, 2  ;;  %v4108_v14 = vmul.f32 %v3700_v7, %v2544_v15 }
 0x119   : > { %v1136_v24 = vmul.f32 %v4813_v32, %v2546_v16  ;;  %v4114_v46 = vmul.f32 %v3700_v7, %v2546_v16  ;;  %v451_v13 = vsel %vm433_vm0, %v449_v54, %v4636_v58  ;;  %v827_v0 = vmul.f32 %v4813_v32, %v2535_v11  ;;  %v4129_v54 = vld [vmem:[%s2524_s5 + $0x80] sm:$0xff] }
 0x11a   : > { %v1430_v50 = vadd.f32 %v1398_v2, %v1365_v49  ;;  %v997_v55 = vrot.slane %v895_v53, 1  ;;  %v552_v12 = vadd.f32 %v451_v13, %v278_v60  ;;  %v693_v41 = vsel %vm675_vm1, %v691_v6, %v4635_v1  ;;  %v2323_v2 = vld [vmem:[%s2524_s5 + $0x78] sm:$0xff] }
 0x11b   : > { %v4640_v62 = vrot.slane %v4108_v14, 1  ;;  %v1238_v29 = vrot.slane %v1136_v24, 2  ;;  %v4639_v63 = vrot.slane %v4114_v46, 2  ;;  %v1442_v49 = vmul.f32 %v2323_v2, %v2562_v23 }
 0x11c   : > { %v1671_v4 = vadd.f32 %v1606_v33, %v1430_v50  ;;  %v4133_v32 = vmul.f32 %v4129_v54, %v2562_v23  ;;  %v794_v60 = vadd.f32 %v693_v41, %v552_v12  ;;  %v1374_v6 = vmul.f32 %v2323_v2, %v2548_v17 }
 0x11d   : > { %v1683_v53 = vmul.f32 %v2323_v2, %v2574_v28  ;;  %v4139_v33 = vmul.f32 %v4129_v54, %v2574_v28  ;;  %v999_v50 = vsel %vm433_vm0, %v997_v55, %v4640_v62  ;;  %v1544_v13 = vrot.slane %v1442_v49, 1 }
 0x11e   : > { %4814 = vst [vmem:[#allocation13_spill] sm:$0xff] %v4133_v32  ;;  %v1912_v24 = vadd.f32 %v1847_v40, %v1671_v4  ;;  %v4643_v1 = vrot.slane %v4133_v32, 1  ;;  %v859_v58 = vadd.f32 %v827_v0, %v794_v60  ;;  %v1240_v41 = vsel %vm675_vm1, %v1238_v29, %v4639_v63  ;;  %v4153_v40 = vld [vmem:[%s2524_s5 + $0xb0] sm:$0xff] }
 0x11f   : > { %4815 = vst [vmem:[#allocation5_spill] sm:$0xff] %v4139_v33  ;;  %v1785_v12 = vrot.slane %v1683_v53, 2  ;;  %v4642_v2 = vrot.slane %v4139_v33, 2  ;;  %v286_v30 = vmul.f32 %v2325_v5, %v2529_v8  ;;  %v358_v4 = vmul.f32 %v2325_v5, %v2531_v9 }
 0x120   : > { %2040 = vmatmul.f32.gmra.mxu3 %v1912_v24  ;;  %v4157_v55 = vmul.f32 %v4153_v40, %v2531_v9  ;;  %v600_v0 = vmul.f32 %v2325_v5, %v2533_v10  ;;  %v1100_v49 = vadd.f32 %v999_v50, %v859_v58  ;;  %v1546_v29 = vsel %vm433_vm0, %v1544_v13, %v4643_v1 }
 0x121   : > { %v1787_v60 = vsel %vm675_vm1, %v1785_v12, %v4642_v2  ;;  %v4168_v53 = vmul.f32 %v4153_v40, %v2533_v10  ;;  %v469_v24 = vrot.slane %v358_v4, 1  ;;  %v907_v5 = vmul.f32 %v4817_v27, %v2544_v15 }
 0x122   : > { %v4648_v63 = vrot.slane %v4157_v55, 1  ;;  %v711_v62 = vrot.slane %v600_v0, 2  ;;  %v1341_v58 = vadd.f32 %v1240_v41, %v1100_v49  ;;  %v4176_v13 = vmul.f32 %v3773_v59, %v2544_v15 }
 0x123   : > { %4816 = vst [vmem:[#allocation16_spill] sm:$0xff] %v4168_v53  ;;  %v4649_v50 = vrot.slane %v4168_v53, 2  ;;  %v1148_v12 = vmul.f32 %v4817_v27, %v2546_v16  ;;  %v835_v0 = vmul.f32 %v4817_v27, %v2535_v11  ;;  %v1017_v2 = vrot.slane %v907_v5, 1  ;;  %v4197_v27 = vld [vmem:[%s2524_s5 + $0xe0] sm:$0xff] }
 0x124   : > { %v471_v4 = vsel %vm433_vm0, %v469_v24, %v4648_v63  ;;  %v4187_v41 = vmul.f32 %v3773_v59, %v2546_v16  ;;  %v1406_v49 = vadd.f32 %v1374_v6, %v1341_v58  ;;  %v4652_v52 = vrot.slane %v4176_v13, 1  ;;  %v2327_v24 = vld [vmem:[%s2524_s5 + $0xd8] sm:$0xff]  ;;  %4818 = vst [vmem:[#allocation18_spill] sm:$0xff] %v4197_v27 }
 0x125   : > { %v560_v1 = vadd.f32 %v471_v4, %v286_v30  ;;  %v713_v48 = vsel %vm675_vm1, %v711_v62, %v4649_v50  ;;  %v1258_v33 = vrot.slane %v1148_v12, 2  ;;  %v1454_v63 = vmul.f32 %v2327_v24, %v2562_v23 }
 0x126   : > { %v4201_v5 = vmul.f32 %v4197_v27, %v2562_v23  ;;  %v1647_v30 = vadd.f32 %v1546_v29, %v1406_v49  ;;  %v1695_v58 = vmul.f32 %v2327_v24, %v2574_v28  ;;  %v1019_v62 = vsel %vm433_vm0, %v1017_v2, %v4652_v52 }
 0x127   : > { %v802_v6 = vadd.f32 %v713_v48, %v560_v1  ;;  %v1564_v12 = vrot.slane %v1454_v63, 1  ;;  %v4210_v50 = vmul.f32 %v4197_v27, %v2574_v28  ;;  %v4819_v53 = vrot.slane %v4187_v41, 2  ;;  %v2329_v63 = vld [vmem:[%s2524_s5 + $0x118] sm:$0x3] }
 0x128   : > { %v1888_v32 = vadd.f32 %v1787_v60, %v1647_v30  ;;  %v1382_v48 = vmul.f32 %v2327_v24, %v2548_v17  ;;  %v1805_v1 = vrot.slane %v1695_v58, 2  ;;  %v295_v2 = vmul.f32 %v3952_v44, %v2529_v8 }
 0x129   : > { %v867_v59 = vadd.f32 %v835_v0, %v802_v6  ;;  %v1260_v29 = vsel %vm675_vm1, %v1258_v33, %v4819_v53  ;;  %v372_v49 = vmul.f32 %v2329_v63, %v2531_v9  ;;  %v614_v52 = vmul.f32 %v2329_v63, %v2533_v10  ;;  %v4820_v0 = vld [vmem:[#allocation14_spill] sm:$0xff] }
 0x12a   : > { %1968 = vmatmul.f32.gmra.mxu0 %v1888_v32  ;;  %v921_v30 = vmul.f32 %v4820_v0, %v2544_v15  ;;  %v1162_v33 = vmul.f32 %v4820_v0, %v2546_v16  ;;  %v4821_v53 = vrot.slane %v4201_v5, 1  ;;  %v844_v32 = vmul.f32 %v4811_v34, %v2535_v11 }
 0x12b   : > { %v1108_v4 = vadd.f32 %v1019_v62, %v867_v59  ;;  %v492_v44 = vrot.slane %v372_v49, 1  ;;  %v734_v6 = vrot.slane %v614_v52, 2  ;;  %v2330_v62 = vld [vmem:[%s2524_s5 + $0x148] sm:$0x3]  ;;  %v4822_v60 = vrot.slane %v3956_v47, 1 }
 0x12c   : > { %v1566_v24 = vsel %vm433_vm0, %v1564_v12, %v4821_v53  ;;  %v1040_v59 = vrot.slane %v921_v30, 1  ;;  %v1468_v63 = vmul.f32 %v2330_v62, %v2562_v23  ;;  %v4823_v0 = vrot.slane %v3962_v21, 2 }
 0x12d   : > { %v1349_v58 = vadd.f32 %v1260_v29, %v1108_v4  ;;  %v493_v27 = vsel %vm433_vm0, %v4822_v60, %v492_v44  ;;  %v1281_v49 = vrot.slane %v1162_v33, 2  ;;  %v1709_v52 = vmul.f32 %v2330_v62, %v2574_v28  ;;  %v2331_v44 = vld [vmem:[%s2524_s5 + $0x178] sm:$0x3] }
 0x12e   : > { %v735_v12 = vsel %vm675_vm1, %v4823_v0, %v734_v6  ;;  %v4824_v29 = vrot.slane %v4210_v50, 2  ;;  %v569_v30 = vadd.f32 %v493_v27, %v295_v2  ;;  %v1391_v53 = vmul.f32 %v3997_v3, %v2548_v17 }
 0x12f   : > { %v1414_v4 = vadd.f32 %v1382_v48, %v1349_v58  ;;  %v4825_v47 = vrot.slane %v3977_v38, 1  ;;  %v303_v21 = vmul.f32 %v4017_v31, %v2529_v8  ;;  %v384_v33 = vmul.f32 %v2331_v44, %v2531_v9 }
 0x130   : > { %v1807_v34 = vsel %vm675_vm1, %v1805_v1, %v4824_v29  ;;  %v626_v48 = vmul.f32 %v2331_v44, %v2533_v10  ;;  %v811_v58 = vadd.f32 %v735_v12, %v569_v30  ;;  %v1587_v62 = vrot.slane %v1468_v63, 1  ;;  %v267_v1 = vld [vmem:[%s2524_s5 + $0x1a8] sm:$0x3] }
 0x131   : > { %v1041_v60 = vsel %vm433_vm0, %v4825_v47, %v1040_v59  ;;  %v1655_v6 = vadd.f32 %v1566_v24, %v1414_v4  ;;  %v933_v27 = vmul.f32 %v2544_v15, %v3837_v22  ;;  %v4826_v3 = vrot.slane %v3983_v56, 2 }
 0x132   : > { %v1828_v2 = vrot.slane %v1709_v52, 2  ;;  %v512_v59 = vrot.slane %v384_v33, 1  ;;  %v754_v0 = vrot.slane %v626_v48, 2  ;;  %v876_v29 = vadd.f32 %v844_v32, %v811_v58  ;;  %v4272_v32 = vpop.f32.mrf.mxu1  ;;  %v4277_v33 = vpop.f32.mrf.mxu2 }
 0x133   : > { %v1282_v38 = vsel %vm675_vm1, %v4826_v3, %v1281_v49  ;;  %v1896_v31 = vadd.f32 %v1807_v34, %v1655_v6  ;;  %v852_v47 = vmul.f32 %v2535_v11, %v3605_v25  ;;  %v1174_v24 = vmul.f32 %v2546_v16, %v3837_v22  ;;  %v4270_v34 = vpop.f32.mrf.mxu0 }
 0x134   : > { %v4827_v63 = vrot.slane %v4021_v36, 1  ;;  %v4828_v4 = vrot.slane %v4029_v26, 2  ;;  %v1060_v49 = vrot.slane %v933_v27, 1  ;;  %v1480_v52 = vmul.f32 %v2562_v23, %v267_v1  ;;  %v4279_v26 = vpop.f32.mrf.mxu3 }
 0x135   : > { %1992 = vmatmul.f32.gmra.mxu1 %v1896_v31  ;;  %v1117_v25 = vadd.f32 %v1041_v60, %v876_v29  ;;  %v4829_v22 = vrot.slane %v4001_v51, 1  ;;  %v1301_v44 = vrot.slane %v1174_v24, 2  ;;  %v4830_v48 = vrot.slane %v4009_v45, 2  ;;  %v2332_v60 = vld [vmem:[%s2524_s5 + $0x58] sm:$0x3] }
 0x136   : > { %v513_v12 = vsel %vm433_vm0, %v4827_v63, %v512_v59  ;;  %v755_v56 = vsel %vm675_vm1, %v4828_v4, %v754_v0  ;;  %v1399_v58 = vmul.f32 %v2548_v17, %v4042_v57  ;;  %v1721_v27 = vmul.f32 %v2574_v28, %v267_v1 }
 0x137   : > { %v1588_v36 = vsel %vm433_vm0, %v4829_v22, %v1587_v62  ;;  %v577_v30 = vadd.f32 %v513_v12, %v303_v21  ;;  %v1829_v6 = vsel %vm675_vm1, %v4830_v48, %v1828_v2  ;;  %v348_v51 = vmul.f32 %v2332_v60, %v2531_v9 }
 0x138   : > { %v1358_v3 = vadd.f32 %v1282_v38, %v1117_v25  ;;  %v279_v21 = vmul.f32 %v4085_v61, %v2529_v8  ;;  %v590_v59 = vmul.f32 %v2332_v60, %v2533_v10  ;;  %v4831_v0 = vrot.slane %v4049_v39, 1 }
 0x139   : > { %v819_v62 = vadd.f32 %v755_v56, %v577_v30  ;;  %v4832_v2 = vrot.slane %v4058_v35, 2  ;;  %v1607_v31 = vrot.slane %v1480_v52, 1  ;;  %v452_v1 = vrot.slane %v348_v51, 1  ;;  %v2333_v30 = vld [vmem:[%s2524_s5 + $0x88] sm:$0x3] }
 0x13a   : > { %v1061_v45 = vsel %vm433_vm0, %v4831_v0, %v1060_v49  ;;  %v1423_v29 = vadd.f32 %v1391_v53, %v1358_v3  ;;  %v694_v38 = vrot.slane %v590_v59, 2  ;;  %v897_v63 = vmul.f32 %v3895_v19, %v2544_v15  ;;  %v1978_v48 = vpop.f32.mrf.mxu1  ;;  %v2002_v51 = vpop.f32.mrf.mxu2 }
 0x13b   : > { %v1302_v57 = vsel %vm675_vm1, %v4832_v2, %v1301_v44  ;;  %v884_v24 = vadd.f32 %v852_v47, %v819_v62  ;;  %v1848_v61 = vrot.slane %v1721_v27, 2  ;;  %v4833_v12 = vrot.slane %v4089_v18, 1  ;;  %v1954_v44 = vpop.f32.mrf.mxu0  ;;  %v2334_v2 = vld [vmem:[%s2524_s5 + $0xb8] sm:$0x3] }
 0x13c   : > { %v828_v4 = vmul.f32 %v3700_v7, %v2535_v11  ;;  %v1138_v35 = vmul.f32 %v3895_v19, %v2546_v16  ;;  %v1664_v56 = vadd.f32 %v1588_v36, %v1423_v29  ;;  %v4834_v53 = vrot.slane %v4100_v37, 2  ;;  %v4315_v37 = vpop.f32.mrf.mxu3 }
 0x13d   : > { %v453_v39 = vsel %vm433_vm0, %v4833_v12, %v452_v1  ;;  %v1125_v49 = vadd.f32 %v1061_v45, %v884_v24  ;;  %v1000_v25 = vrot.slane %v897_v63, 1  ;;  %v1444_v18 = vmul.f32 %v2333_v30, %v2562_v23 }
 0x13e   : > { %v553_v52 = vadd.f32 %v453_v39, %v279_v21  ;;  %v695_v47 = vsel %vm675_vm1, %v4834_v53, %v694_v38  ;;  %v1241_v22 = vrot.slane %v1138_v35, 2  ;;  %v1905_v7 = vadd.f32 %v1829_v6, %v1664_v56  ;;  %v4840_v39 = vld [vmem:[#allocation16_spill] sm:$0xff]  ;;  %v4842_v56 = vld [vmem:[#allocation13_spill] sm:$0xff] }
 0x13f   : > { %v1366_v27 = vadd.f32 %v1302_v57, %v1125_v49  ;;  %v4835_v19 = vrot.slane %v4065_v20, 1  ;;  %v4836_v3 = vrot.slane %v4073_v42, 2  ;;  %v4837_v21 = vrot.slane %v4108_v14, 1 }
 0x140   : > { %v795_v60 = vadd.f32 %v695_v47, %v553_v52  ;;  %v1375_v6 = vmul.f32 %v4129_v54, %v2548_v17  ;;  %v1685_v0 = vmul.f32 %v2333_v30, %v2574_v28  ;;  %2019 = vmatmul.f32.gmra.mxu2 %v1905_v7  ;;  %v360_v57 = vmul.f32 %v2334_v2, %v2531_v9  ;;  %v4342_v9 = vld [vmem:[%s4490_s3] ss:$0 sm:$0xff]  ;;  %v4844_v47 = vld [vmem:[#allocation12_spill] sm:$0xff] }
 0x141   : > { %v1608_v36 = vsel %vm433_vm0, %v4835_v19, %v1607_v31  ;;  %v1849_v62 = vsel %vm675_vm1, %v4836_v3, %v1848_v61  ;;  %v1001_v59 = vsel %vm433_vm0, %v4837_v21, %v1000_v25  ;;  %v1431_v20 = vadd.f32 %v1399_v58, %v1366_v27 }
 0x142   : > { %v860_v45 = vadd.f32 %v828_v4, %v795_v60  ;;  %v602_v42 = vmul.f32 %v2334_v2, %v2533_v10  ;;  %v4838_v31 = vrot.slane %v4114_v46, 2  ;;  %v1547_v1 = vrot.slane %v1444_v18, 1  ;;  %v1981_v30 = vpop.f32.mrf.mxu1  ;;  %v2005_v19 = vpop.f32.mrf.mxu2  ;;  %v4845_v60 = vld [vmem:[#allocation5_spill] sm:$0xff] }
 0x143   : > { %v287_v54 = vmul.f32 %v4153_v40, %v2529_v8  ;;  %v909_v29 = vmul.f32 %v3927_v43, %v2544_v15  ;;  %v1672_v24 = vadd.f32 %v1608_v36, %v1431_v20  ;;  %v472_v38 = vrot.slane %v360_v57, 1 }
 0x144   : > { %v1242_v14 = vsel %vm675_vm1, %v4838_v31, %v1241_v22  ;;  %v1101_v58 = vadd.f32 %v1001_v59, %v860_v45  ;;  %v714_v63 = vrot.slane %v602_v42, 2  ;;  %v1788_v10 = vrot.slane %v1685_v0, 2  ;;  %v2335_v22 = vld [vmem:[%s2524_s5 + $0xe8] sm:$0x3]  ;;  %v2029_v36 = vpop.f32.mrf.mxu3  ;;  %s4372_s5 = scalar_lea.vmem [#allocation2], %s2178_s22 }
 0x145   : > { %v1020_v46 = vrot.slane %v909_v29, 1  ;;  %v1150_v8 = vmul.f32 %v3927_v43, %v2546_v16  ;;  %v1913_v40 = vadd.f32 %v1849_v62, %v1672_v24  ;;  %v4839_v15 = vrot.slane %v4157_v55, 1  ;;  %v1957_v43 = vpop.f32.mrf.mxu0  ;;  %s2095_s8 = sshll.u32 %s4372_s5, 4  ;;  %s2096_s8 = int_to_ptr.vmem [resolvable:$true] %s2095_s8 }
 0x146   : > { %v1342_v61 = vadd.f32 %v1242_v14, %v1101_v58  ;;  %v4841_v4 = vrot.slane %v4840_v39, 2  ;;  %v4843_v49 = vrot.slane %v4842_v56, 1  ;;  %v836_v25 = vmul.f32 %v4844_v47, %v2535_v11 }
 0x147   : > { %v473_v12 = vsel %vm433_vm0, %v4839_v15, %v472_v38  ;;  %v1456_v16 = vmul.f32 %v2335_v22, %v2562_v23  ;;  %2043 = vmatmul.f32.gmra.mxu3 %v1913_v40  ;;  %v1261_v18 = vrot.slane %v1150_v8, 2  ;;  %v1952_v7 = vadd.f32 %v4342_v9, %v4270_v34 }
 0x148   : > { %v715_v35 = vsel %vm675_vm1, %v4841_v4, %v714_v63  ;;  %v1548_v52 = vsel %vm433_vm0, %v4843_v49, %v1547_v1  ;;  %v561_v53 = vadd.f32 %v473_v12, %v287_v54  ;;  %v1407_v55 = vadd.f32 %v1375_v6, %v1342_v61 }
 0x149   : > { %v1976_v27 = vadd.f32 %v4342_v9, %v4272_v32  ;;  %v4846_v3 = vrot.slane %v4845_v60, 2  ;;  %v4847_v23 = vrot.slane %v4176_v13, 1  ;;  %v2000_v59 = vadd.f32 %v4342_v9, %v4277_v33  ;;  %2047 = vst [vmem:[%s4372_s5] sm:$0xff] %v1952_v7 }
 0x14a   : > { %v803_v62 = vadd.f32 %v715_v35, %v561_v53  ;;  %v1648_v6 = vadd.f32 %v1548_v52, %v1407_v55  ;;  %v1697_v34 = vmul.f32 %v2335_v22, %v2574_v28  ;;  %v2024_v32 = vadd.f32 %v4342_v9, %v4279_v26  ;;  %v4849_v26 = vld [vmem:[#allocation18_spill] sm:$0xff]  ;;  %v1984_v29 = vpop.f32.mrf.mxu1  ;;  %v2008_v24 = vpop.f32.mrf.mxu2 }
 0x14b   : > { %v1789_v11 = vsel %vm675_vm1, %v4846_v3, %v1788_v10  ;;  %v1021_v21 = vsel %vm433_vm0, %v4847_v23, %v1020_v46  ;;  %v1955_v13 = vadd.f32 %v4342_v9, %v1954_v44  ;;  %2055 = vst [vmem:[%s4372_s5 + $0x40] sm:$0xff] %v1976_v27  ;;  %v1979_v33 = vadd.f32 %v4342_v9, %v1978_v48 }
 0x14c   : > { %v868_v0 = vadd.f32 %v836_v25, %v803_v62  ;;  %v1889_v20 = vadd.f32 %v1789_v11, %v1648_v6  ;;  %v4848_v28 = vrot.slane %v4187_v41, 2  ;;  %v1567_v2 = vrot.slane %v1456_v16, 1  ;;  %2063 = vst [vmem:[%s4372_s5 + $0x80] sm:$0xff] %v2000_v59  ;;  %v2032_v46 = vpop.f32.mrf.mxu3 }
 0x14d   : > { %v2003_v57 = vadd.f32 %v4342_v9, %v2002_v51  ;;  %v1383_v31 = vmul.f32 %v4849_v26, %v2548_v17  ;;  %2071 = vst [vmem:[%s4372_s5 + $0xc0] sm:$0xff] %v2024_v32  ;;  %v2027_v44 = vadd.f32 %v4342_v9, %v4315_v37  ;;  %v1808_v48 = vrot.slane %v1697_v34, 2  ;;  %v1960_v1 = vpop.f32.mrf.mxu0 }
 0x14e   : > { %v1262_v45 = vsel %vm675_vm1, %v4848_v28, %v1261_v18  ;;  %v1109_v42 = vadd.f32 %v1021_v21, %v868_v0  ;;  %1971 = vmatmul.f32.gmra.mxu0 %v1889_v20  ;;  %2048 = vst [vmem:[%s4372_s5 + $0x8] sm:$0xff] %v1955_v13  ;;  %v1958_v41 = vadd.f32 %v4342_v9, %v1957_v43  ;;  %v4850_v54 = vrot.slane %v4201_v5, 1 }
 0x14f   : > { %2056 = vst [vmem:[%s4372_s5 + $0x48] sm:$0xff] %v1979_v33  ;;  %v1982_v51 = vadd.f32 %v4342_v9, %v1981_v30  ;;  %v2006_v37 = vadd.f32 %v4342_v9, %v2005_v19  ;;  %v2030_v38 = vadd.f32 %v4342_v9, %v2029_v36  ;;  %v4851_v63 = vrot.slane %v4210_v50, 2 }
 0x150   : > { %v1350_v14 = vadd.f32 %v1262_v45, %v1109_v42  ;;  %v1568_v17 = vsel %vm433_vm0, %v4850_v54, %v1567_v2  ;;  %2064 = vst [vmem:[%s4372_s5 + $0x88] sm:$0xff] %v2003_v57  ;;  %v1961_v10 = vadd.f32 %v4342_v9, %v1960_v1  ;;  %v1985_v40 = vadd.f32 %v4342_v9, %v1984_v29 }
 0x151   : > { %2072 = vst [vmem:[%s4372_s5 + $0xc8] sm:$0xff] %v2027_v44  ;;  %v1809_v5 = vsel %vm675_vm1, %v4851_v63, %v1808_v48  ;;  %v2009_v61 = vadd.f32 %v4342_v9, %v2008_v24  ;;  %v2033_v50 = vadd.f32 %v4342_v9, %v2032_v46 }
 0x152   : > { %v1415_v58 = vadd.f32 %v1383_v31, %v1350_v14  ;;  %2049 = vst [vmem:[%s4372_s5 + $0x10] sm:$0xff] %v1958_v41  ;;  %v2011_v12 = vpop.f32.mrf.mxu2 }
 0x153   : > { %2057 = vst [vmem:[%s4372_s5 + $0x50] sm:$0xff] %v1982_v51  ;;  %v2012_v39 = vadd.f32 %v4342_v9, %v2011_v12 }
 0x154   : > { %v1656_v8 = vadd.f32 %v1568_v17, %v1415_v58  ;;  %2065 = vst [vmem:[%s4372_s5 + $0x90] sm:$0xff] %v2006_v37 }
 0x155   : > { %2073 = vst [vmem:[%s4372_s5 + $0xd0] sm:$0xff] %v2030_v38 }
 0x156   : > { %v1897_v15 = vadd.f32 %v1809_v5, %v1656_v8  ;;  %2050 = vst [vmem:[%s4372_s5 + $0x18] sm:$0xff] %v1961_v10 }
 0x157   : > { %2058 = vst [vmem:[%s4372_s5 + $0x58] sm:$0xff] %v1985_v40  ;;  %v2035_v4 = vpop.f32.mrf.mxu3 }
 0x158   : > { %1995 = vmatmul.f32.gmra.mxu1 %v1897_v15  ;;  %2066 = vst [vmem:[%s4372_s5 + $0x98] sm:$0xff] %v2009_v61  ;;  %v2036_v35 = vadd.f32 %v4342_v9, %v2035_v4 }
 0x159   : > { %2074 = vst [vmem:[%s4372_s5 + $0xd8] sm:$0xff] %v2033_v50 }
 0x15a   : > { %2067 = vst [vmem:[%s4372_s5 + $0xa0] sm:$0xff] %v2012_v39 }
 0x15b   : > { %2075 = vst [vmem:[%s4372_s5 + $0xe0] sm:$0xff] %v2036_v35  ;;  %v1963_v56 = vpop.f32.mrf.mxu0 }
 0x15c   : > { %v1964_v49 = vadd.f32 %v4342_v9, %v1963_v56 }
 0x15e   : > { %2051 = vst [vmem:[%s4372_s5 + $0x20] sm:$0xff] %v1964_v49 }
 0x166   : > { %v1987_v52 = vpop.f32.mrf.mxu1 }
 0x167   : > { %v1988_v53 = vadd.f32 %v4342_v9, %v1987_v52 }
 0x169   : > { %2059 = vst [vmem:[%s4372_s5 + $0x60] sm:$0xff] %v1988_v53 }
 0x179   : > { %v2014_v47 = vpop.f32.mrf.mxu2 }
 0x17a   : > { %v2015_v25 = vadd.f32 %v4342_v9, %v2014_v47 }
 0x17c   : > { %2068 = vst [vmem:[%s4372_s5 + $0xa8] sm:$0xff] %v2015_v25 }
 0x180   : > { %v2038_v16 = vpop.f32.mrf.mxu3 }
 0x181   : > { %v1966_v22 = vpop.f32.mrf.mxu0  ;;  %v2039_v30 = vadd.f32 %v4342_v9, %v2038_v16 }
 0x182   : > { %v1967_v43 = vadd.f32 %v4342_v9, %v1966_v22 }
 0x183   : > { %2076 = vst [vmem:[%s4372_s5 + $0xe8] sm:$0xff] %v2039_v30 }
 0x184   : > { %2052 = vst [vmem:[%s4372_s5 + $0x28] sm:$0xff] %v1967_v43 }
 0x18b   : > { %v1990_v55 = vpop.f32.mrf.mxu1 }
 0x18c   : > { %v1991_v18 = vadd.f32 %v4342_v9, %v1990_v55 }
 0x18e   : > { %2060 = vst [vmem:[%s4372_s5 + $0x68] sm:$0xff] %v1991_v18 }
 0x197   : > { %v2017_v7 = vpop.f32.mrf.mxu2 }
 0x198   : > { %v2018_v27 = vadd.f32 %v4342_v9, %v2017_v7 }
 0x19a   : > { %2069 = vst [vmem:[%s4372_s5 + $0xb0] sm:$0xff] %v2018_v27 }
 0x1a3   : > { %v2041_v19 = vpop.f32.mrf.mxu3 }
 0x1a4   : > { %v2042_v36 = vadd.f32 %v4342_v9, %v2041_v19 }
 0x1a6   : > { %2077 = vst [vmem:[%s4372_s5 + $0xf0] sm:$0xff] %v2042_v36 }
 0x1a7   : > { %v1969_v60 = vpop.f32.mrf.mxu0 }
 0x1a8   : > { %v1970_v3 = vadd.f32 %v4342_v9, %v1969_v60 }
 0x1aa   : > { %2053 = vst [vmem:[%s4372_s5 + $0x30] sm:$0xff] %v1970_v3 }
 0x1b2   : > { %v1993_v11 = vpop.f32.mrf.mxu1 }
 0x1b3   : > { %v1994_v62 = vadd.f32 %v4342_v9, %v1993_v11 }
 0x1b5   : > { %2061 = vst [vmem:[%s4372_s5 + $0x70] sm:$0xff] %v1994_v62 }
 0x1c3   : > { %v2020_v23 = vpop.f32.mrf.mxu2 }
 0x1c4   : > { %v2021_v21 = vadd.f32 %v4342_v9, %v2020_v23 }
 0x1c6   : > { %2070 = vst [vmem:[%s4372_s5 + $0xb8] sm:$0xff] %v2021_v21 }
 0x1ca   : > { %v2044_v6 = vpop.f32.mrf.mxu3 }
 0x1cb   : > { %v1972_v59 = vpop.f32.mrf.mxu0  ;;  %v2045_v32 = vadd.f32 %v4342_v9, %v2044_v6 }
 0x1cc   : > { %v1973_v34 = vadd.f32 %v4342_v9, %v1972_v59 }
 0x1cd   : > { %2078 = vst [vmem:[%s4372_s5 + $0xf8] sm:$0xff] %v2045_v32 }
 0x1ce   : > { %2054 = vst [vmem:[%s4372_s5 + $0x38] sm:$0xff] %v1973_v34 }
 0x1d5   : > { %v1996_v13 = vpop.f32.mrf.mxu1 }
 0x1d6   : > { %v1997_v0 = vadd.f32 %v4342_v9, %v1996_v13 }
 0x1d8   : > { %2062 = vst [vmem:[%s4372_s5 + $0x78] sm:$0xff] %v1997_v0 }
 0x1d9   : > { %2363 = shalt.err (!%p2360_p5)
}
 0x1da   : > { %s2416_s21 = smov 128   ;;  %s2417_s26 = smov 8  }
 0x1db   : > { %2235 = dma.vmem_to_hbm [thread:$0]  (%p2483_p4), %s2096_s8, 4096, %s2098_s9, %s2080_s18, %s2416_s21, %s2416_s21, %s2417_s26  }
 0x1dc PF: > { %p2241_p6 = scmp.ge.s32.totalorder %s2414_s20, 2  ;;  %s2112_s5 = sand.u32 1, %s2394_s15  }
 0x1dd   : > { %s2113_s29 = scalar_lea.sflag [#allocation3], %s2112_s5 }
 0x1de   : > { %p2238_p7 = pnand %p2241_p6, %p2490_p8 }
 0x1e0   : > { %p2239_p9 = pneg %p2238_p7 }
 0x1e2   : > { %2389 = dma.done.wait (%p2239_p9), %s2113_s29, 4096  }
 0x1e3   : > { %2391 = vsyncadd (%p2239_p9), %s2113_s29, 4294963200  ;;  %s17_s20 = sadd.s32 1, %s2414_s20   ;;  %s4852_s15 = smov %s2398_s16 }
 0x1e4   : > { %p14_p10 = scmp.ge.s32.totalorder %s17_s20, 4   ;;  %s4853_s16 = smov %s2402_s17 }
 0x1e5   : > { %s4854_s17 = smov %s2496_s28  ;;  %s4855_s18 = smov %s2410_s19 }
 0x1e6   : > { %s4856_s19 = smov %s4858_s23  ;;  %16 = sbr.rel (!%p14_p10) target bundleno = 4 (0x4), region = 72 }
 0x1eb   :  { %2119 = vsyncpa [#allocation3], 1 }
 0x1ec   :  { %2121 = vsyncpa [#allocation3 + $0x1], 1 }

</bundles_post_ra>
